<compile_context>
chip_gen: v7x
topology: tpu7x:2x2x1
jax: 0.10.0
libtpu: 0.0.40
codegen_flags: <defaults>
</compile_context>

<pallas_src>
import functools

import jax
import jax.numpy as jnp
from jax.experimental import pallas as pl
from jax.experimental.pallas import tpu as pltpu


def _vit_attn_kernel(x_ref, g_ref, b_ref, wqkv_ref, wo_ref, bo_ref, o_ref, *,
                     heads, dim_head, batch_tile, seq_len, eps):
    Bt, N, dh = batch_tile, seq_len, dim_head
    D = x_ref.shape[-1]
    inner = heads * dh
    M = Bt * N
    BH = heads * Bt

    # ---- LayerNorm over D (f32; matches nn.LayerNorm eps) -------------------
    x = x_ref[...].reshape(M, D).astype(jnp.float32)            # (M, D)
    inv_d = 1.0 / D
    s1 = jnp.sum(x, axis=-1, keepdims=True)                     # independent XLU
    s2 = jnp.sum(x * x, axis=-1, keepdims=True)                 # reductions
    mean = s1 * inv_d
    var = s2 * inv_d - mean * mean
    xn = (x - mean) * jax.lax.rsqrt(var + eps)
    xn = xn * g_ref[...] + b_ref[...]                           # (M, D)
    xn_bf = xn.astype(jnp.bfloat16)                             # bf16 MXU inputs

    # ---- fused QKV projection: one (M, D) @ (D, 3*inner) matmul -------------
    # (scale is folded into the Q columns by the wrapper)
    qkv = jnp.dot(xn_bf, wqkv_ref[...], preferred_element_type=jnp.float32)
    qkv_bf = qkv.astype(jnp.bfloat16)                           # (M, 3*inner)

    def heads_to_batch(base):
        # column block [base, base+inner) of (M, inner), split per head and
        # restacked so heads merge into the leading batch axis:
        # -> (heads*Bt, N, dh), batch index = h*Bt + b.
        slabs = [
            qkv_bf[:, base + h * dh: base + (h + 1) * dh].reshape(Bt, N, dh)
            for h in range(heads)
        ]
        return jnp.concatenate(slabs, axis=0)

    q3 = heads_to_batch(0)                                      # (BH, N, dh)
    k3 = heads_to_batch(inner)
    v3 = heads_to_batch(2 * inner)

    # ---- attention: ONE batched matmul stream over heads*Bt -----------------
    dots = jnp.einsum('bnd,bmd->bnm', q3, k3,
                      preferred_element_type=jnp.float32)       # (BH, N, N)
    dmax = jnp.max(dots, axis=-1, keepdims=True)
    p = jnp.exp(dots - dmax)
    denom = jnp.sum(p, axis=-1, keepdims=True)
    if N > dh:
        # cheaper to normalize the (BH, N, dh) context than the (BH, N, N) probs
        ctx = jnp.einsum('bnm,bmd->bnd', p.astype(jnp.bfloat16), v3,
                         preferred_element_type=jnp.float32)
        ctx = ctx * pl.reciprocal(denom, approx=True)
    else:
        p = p * pl.reciprocal(denom, approx=True)
        ctx = jnp.einsum('bnm,bmd->bnd', p.astype(jnp.bfloat16), v3,
                         preferred_element_type=jnp.float32)    # (BH, N, dh)

    # ---- fused output projection --------------------------------------------
    # (BH, N, dh) -> (heads, M, dh) is a pure reshape (batch index is h-major),
    # then one batched matmul against (heads, dh, D) and a major-axis sum.
    ctx_bf = ctx.astype(jnp.bfloat16).reshape(heads, M, dh)
    per_head = jnp.einsum('hmd,hdo->hmo', ctx_bf, wo_ref[...],
                          preferred_element_type=jnp.float32)   # (heads, M, D)
    out = jnp.sum(per_head, axis=0) + bo_ref[...]               # (M, D)
    o_ref[...] = out.reshape(Bt, N, D).astype(o_ref.dtype)


def vit_attention(x, gamma, beta, w_qkv, w_out, b_out, *, heads, dim_head,
                  eps=1e-5, batch_tile=None):
    """x:(B,N,D), gamma/beta:(1,D), w_qkv:(D,3*inner), w_out:(inner,D), b_out:(1,D)."""
    B, N, D = x.shape
    inner = heads * dim_head
    assert w_qkv.shape == (D, 3 * inner) and w_out.shape == (inner, D)
    scale = dim_head ** (-0.5)

    # Single-TC chips (v5e/v6e): one maximal slab (grid of 1) avoids per-step
    # overhead and maximizes MXU row fill.  On dual-TC v7x pass
    # batch_tile = B // 2 so each core gets one maximal "parallel" slab.
    if batch_tile is None:
        batch_tile = B
    assert B % batch_tile == 0, "batch_tile must divide the batch"
    num_steps = B // batch_tile

    # Fold softmax scale into the Q columns; ship weights as bf16 (half the
    # weight DMA/VMEM), f32 accumulation happens inside the MXU.
    w_qkv_s = w_qkv.at[:, :inner].multiply(scale).astype(jnp.bfloat16)
    w_out_h = w_out.reshape(heads, dim_head, D).astype(jnp.bfloat16)
    gamma32 = gamma.astype(jnp.float32)
    beta32 = beta.astype(jnp.float32)
    b_out32 = b_out.astype(jnp.float32)

    kernel = functools.partial(
        _vit_attn_kernel, heads=heads, dim_head=dim_head,
        batch_tile=batch_tile, seq_len=N, eps=eps)

    flops = int(B * N * (2 * D * 3 * inner)                 # fused QKV proj
                + B * heads * (2 * N * N * dim_head) * 2    # QK^T and PV
                + B * N * (2 * inner * D))                   # output proj
    transcendentals = int(B * heads * N * N)                 # softmax exp
    # Weights have constant index_maps -> fetched once (resident), activations
    # stream per grid step.
    bytes_accessed = int(
        x.size * x.dtype.itemsize                            # x in
        + x.size * x.dtype.itemsize                          # out
        + 2 * (w_qkv_s.size + w_out_h.size)                  # bf16 weights, once
        + 4 * (gamma.size + beta.size + b_out.size))

    return pl.pallas_call(
        kernel,
        out_shape=jax.ShapeDtypeStruct((B, N, D), x.dtype),
        grid_spec=pl.GridSpec(
            grid=(num_steps,),
            in_specs=[
                pl.BlockSpec((batch_tile, N, D), lambda b: (b, 0, 0)),     # x tile
                pl.BlockSpec((1, D), lambda b: (0, 0)),                    # gamma
                pl.BlockSpec((1, D), lambda b: (0, 0)),                    # beta
                pl.BlockSpec((D, 3 * inner), lambda b: (0, 0)),            # W_qkv (Q*scale)
                pl.BlockSpec((heads, dim_head, D), lambda b: (0, 0, 0)),   # W_out per head
                pl.BlockSpec((1, D), lambda b: (0, 0)),                    # b_out
            ],
            out_specs=pl.BlockSpec((batch_tile, N, D), lambda b: (b, 0, 0)),
        ),
        compiler_params=pltpu.CompilerParams(
            dimension_semantics=("parallel",),
            # Well under v7x's 64 MiB physical VMEM; plenty for bf16 weights
            # plus double-buffered activation tiles at these dims.
            vmem_limit_bytes=32 * 1024 * 1024),
        cost_estimate=pl.CostEstimate(
            flops=flops, transcendentals=transcendentals,
            bytes_accessed=bytes_accessed),
    )(x, gamma32, beta32, w_qkv_s, w_out_h, b_out32)


def vit_attention_reference(x, gamma, beta, w_qkv, w_out, b_out, *, heads,
                            dim_head, eps=1e-5):
    """Pure-JAX f32 reference mirroring the PyTorch forward."""
    B, N, D = x.shape
    inner = heads * dim_head
    scale = dim_head ** (-0.5)
    mean = jnp.mean(x, axis=-1, keepdims=True)
    var = jnp.mean((x - mean) ** 2, axis=-1, keepdims=True)
    xn = (x - mean) / jnp.sqrt(var + eps) * gamma[0] + beta[0]
    qkv = xn @ w_qkv
    q, k, v = jnp.split(qkv, 3, axis=-1)

    def split_heads(t):
        return jnp.transpose(t.reshape(B, N, heads, dim_head), (0, 2, 1, 3))

    q, k, v = map(split_heads, (q, k, v))
    dots = jnp.einsum("bhnd,bhmd->bhnm", q, k) * scale
    attn = jax.nn.softmax(dots, axis=-1)
    out = jnp.einsum("bhnm,bhmd->bhnd", attn, v)
    out = jnp.transpose(out, (0, 2, 1, 3)).reshape(B, N, inner)
    return out @ w_out + b_out[0]


if __name__ == "__main__":
    # Small, lane-friendly shapes consistent with the module:
    # dim=128, heads=4, dim_head=32 -> inner_dim=128, project_out=True.
    B, N, D = 4, 16, 128
    HEADS, DIM_HEAD = 4, 32
    INNER = HEADS * DIM_HEAD

    key = jax.random.PRNGKey(0)
    kx, kg, kb, kq, ko, kob = jax.random.split(key, 6)

    x = jax.random.normal(kx, (B, N, D), dtype=jnp.float32)
    gamma = 1.0 + 0.1 * jax.random.normal(kg, (1, D), dtype=jnp.float32)   # LN weight
    beta = 0.1 * jax.random.normal(kb, (1, D), dtype=jnp.float32)          # LN bias
    w_qkv = jax.random.normal(kq, (D, 3 * INNER), dtype=jnp.float32) * 0.05  # to_qkv (no bias)
    w_out = jax.random.normal(ko, (INNER, D), dtype=jnp.float32) * 0.05      # to_out weight
    b_out = jax.random.normal(kob, (1, D), dtype=jnp.float32) * 0.05         # to_out bias

    ref = vit_attention_reference(x, gamma, beta, w_qkv, w_out, b_out,
                                  heads=HEADS, dim_head=DIM_HEAD)

    # Single-slab grid (default; optimal for single-TC v5e/v6e).
    out1 = jax.block_until_ready(
        vit_attention(x, gamma, beta, w_qkv, w_out, b_out,
                      heads=HEADS, dim_head=DIM_HEAD))
    # Two-slab grid (v7x-style: one "parallel" slab per TensorCore).
    out2 = jax.block_until_ready(
        vit_attention(x, gamma, beta, w_qkv, w_out, b_out,
                      heads=HEADS, dim_head=DIM_HEAD, batch_tile=B // 2))

    for out in (out1, out2):
        assert out.shape == (B, N, D)
        max_err = float(jnp.max(jnp.abs(out - ref)))
        # bf16 MXU inputs + approx reciprocal vs a pure-f32 reference.
        assert jnp.allclose(out, ref, atol=2e-2, rtol=2e-2), \
            f"mismatch vs reference (max abs err {max_err})"

    print("KERNEL_OK")
</pallas_src>

<mosaic_0001>
module attributes {stable_mosaic.version = 11 : i64} {
  func.func @_vit_attn_kernel(%arg0: i32, %arg1: memref<4x16x128xf32, #tpu.memory_space<vmem>>, %arg2: memref<1x128xf32, #tpu.memory_space<vmem>>, %arg3: memref<1x128xf32, #tpu.memory_space<vmem>>, %arg4: memref<128x384xbf16, #tpu.memory_space<vmem>>, %arg5: memref<4x32x128xbf16, #tpu.memory_space<vmem>>, %arg6: memref<1x128xf32, #tpu.memory_space<vmem>>, %arg7: memref<4x16x128xf32, #tpu.memory_space<vmem>>) attributes {dimension_semantics = [#tpu.dimension_semantics<parallel>], iteration_bounds = array<i64: 1>, scalar_prefetch = 0 : i64, scratch_operands = 0 : i64, tpu.core_type = #tpu.core_type<tc>, window_params = [{transform_indices = @transform_0, window_bounds = array<i64: 4, 16, 128>}, {pipeline_mode = #tpu.pipeline_mode<synchronous>, transform_indices = @transform_1, window_bounds = array<i64: 1, 128>}, {pipeline_mode = #tpu.pipeline_mode<synchronous>, transform_indices = @transform_2, window_bounds = array<i64: 1, 128>}, {pipeline_mode = #tpu.pipeline_mode<synchronous>, transform_indices = @transform_3, window_bounds = array<i64: 128, 384>}, {pipeline_mode = #tpu.pipeline_mode<synchronous>, transform_indices = @transform_4, window_bounds = array<i64: 4, 32, 128>}, {pipeline_mode = #tpu.pipeline_mode<synchronous>, transform_indices = @transform_5, window_bounds = array<i64: 1, 128>}, {transform_indices = @transform_6, window_bounds = array<i64: 4, 16, 128>}]} {
    %c0 = arith.constant 0 : index
    %c0_0 = arith.constant 0 : index
    %c0_1 = arith.constant 0 : index
    %0 = vector.load %arg1[%c0, %c0_0, %c0_1] : memref<4x16x128xf32, #tpu.memory_space<vmem>>, vector<4x16x128xf32>
    %1 = vector.shape_cast %0 : vector<4x16x128xf32> to vector<64x128xf32>
    %cst = arith.constant dense<0.000000e+00> : vector<64xf32>
    %2 = vector.multi_reduction <add>, %1, %cst [1] : vector<64x128xf32> to vector<64xf32>
    %3 = vector.shape_cast %2 : vector<64xf32> to vector<64x1xf32>
    %4 = arith.mulf %1, %1 : vector<64x128xf32>
    %cst_2 = arith.constant dense<0.000000e+00> : vector<64xf32>
    %5 = vector.multi_reduction <add>, %4, %cst_2 [1] : vector<64x128xf32> to vector<64xf32>
    %6 = vector.shape_cast %5 : vector<64xf32> to vector<64x1xf32>
    %cst_3 = arith.constant 7.812500e-03 : f32
    %7 = vector.broadcast %cst_3 : f32 to vector<64x1xf32>
    %8 = arith.mulf %3, %7 : vector<64x1xf32>
    %cst_4 = arith.constant 7.812500e-03 : f32
    %9 = vector.broadcast %cst_4 : f32 to vector<64x1xf32>
    %10 = arith.mulf %6, %9 : vector<64x1xf32>
    %11 = arith.mulf %8, %8 : vector<64x1xf32>
    %12 = arith.subf %10, %11 : vector<64x1xf32>
    %13 = vector.broadcast %8 : vector<64x1xf32> to vector<64x128xf32>
    %14 = arith.subf %1, %13 : vector<64x128xf32>
    %cst_5 = arith.constant 9.99999974E-6 : f32
    %15 = vector.broadcast %cst_5 : f32 to vector<64x1xf32>
    %16 = arith.addf %12, %15 : vector<64x1xf32>
    %17 = math.rsqrt %16 : vector<64x1xf32>
    %18 = vector.broadcast %17 : vector<64x1xf32> to vector<64x128xf32>
    %19 = arith.mulf %14, %18 : vector<64x128xf32>
    %c0_6 = arith.constant 0 : index
    %c0_7 = arith.constant 0 : index
    %20 = vector.load %arg2[%c0_6, %c0_7] : memref<1x128xf32, #tpu.memory_space<vmem>>, vector<1x128xf32>
    %21 = vector.broadcast %20 : vector<1x128xf32> to vector<64x128xf32>
    %22 = arith.mulf %19, %21 : vector<64x128xf32>
    %c0_8 = arith.constant 0 : index
    %c0_9 = arith.constant 0 : index
    %23 = vector.load %arg3[%c0_8, %c0_9] : memref<1x128xf32, #tpu.memory_space<vmem>>, vector<1x128xf32>
    %24 = vector.broadcast %23 : vector<1x128xf32> to vector<64x128xf32>
    %25 = arith.addf %22, %24 : vector<64x128xf32>
    %26 = arith.truncf %25 : vector<64x128xf32> to vector<64x128xbf16>
    %c0_10 = arith.constant 0 : index
    %c0_11 = arith.constant 0 : index
    %27 = vector.load %arg4[%c0_10, %c0_11] : memref<128x384xbf16, #tpu.memory_space<vmem>>, vector<128x384xbf16>
    %cst_12 = arith.constant dense<0.000000e+00> : vector<64x384xf32>
    %28 = tpu.matmul %26, %27, %cst_12 {dimension_numbers = #tpu.dot_dimension_numbers<[1], [0], [0], [1], [0, 0, 1, 1], [], []>} : vector<64x128xbf16>, vector<128x384xbf16>, vector<64x384xf32> -> vector<64x384xf32>
    %29 = arith.truncf %28 : vector<64x384xf32> to vector<64x384xbf16>
    %30 = vector.extract_strided_slice %29 {offsets = [0, 0], sizes = [64, 32], strides = [1, 1]} : vector<64x384xbf16> to vector<64x32xbf16>
    %31 = vector.shape_cast %30 : vector<64x32xbf16> to vector<4x16x32xbf16>
    %32 = vector.extract_strided_slice %29 {offsets = [0, 32], sizes = [64, 32], strides = [1, 1]} : vector<64x384xbf16> to vector<64x32xbf16>
    %33 = vector.shape_cast %32 : vector<64x32xbf16> to vector<4x16x32xbf16>
    %34 = vector.extract_strided_slice %29 {offsets = [0, 64], sizes = [64, 32], strides = [1, 1]} : vector<64x384xbf16> to vector<64x32xbf16>
    %35 = vector.shape_cast %34 : vector<64x32xbf16> to vector<4x16x32xbf16>
    %36 = vector.extract_strided_slice %29 {offsets = [0, 96], sizes = [64, 32], strides = [1, 1]} : vector<64x384xbf16> to vector<64x32xbf16>
    %37 = vector.shape_cast %36 : vector<64x32xbf16> to vector<4x16x32xbf16>
    %38 = tpu.concatenate %31, %33, %35, %37 in 0 : vector<4x16x32xbf16>, vector<4x16x32xbf16>, vector<4x16x32xbf16>, vector<4x16x32xbf16> -> vector<16x16x32xbf16>
    %39 = vector.extract_strided_slice %29 {offsets = [0, 128], sizes = [64, 32], strides = [1, 1]} : vector<64x384xbf16> to vector<64x32xbf16>
    %40 = vector.shape_cast %39 : vector<64x32xbf16> to vector<4x16x32xbf16>
    %41 = vector.extract_strided_slice %29 {offsets = [0, 160], sizes = [64, 32], strides = [1, 1]} : vector<64x384xbf16> to vector<64x32xbf16>
    %42 = vector.shape_cast %41 : vector<64x32xbf16> to vector<4x16x32xbf16>
    %43 = vector.extract_strided_slice %29 {offsets = [0, 192], sizes = [64, 32], strides = [1, 1]} : vector<64x384xbf16> to vector<64x32xbf16>
    %44 = vector.shape_cast %43 : vector<64x32xbf16> to vector<4x16x32xbf16>
    %45 = vector.extract_strided_slice %29 {offsets = [0, 224], sizes = [64, 32], strides = [1, 1]} : vector<64x384xbf16> to vector<64x32xbf16>
    %46 = vector.shape_cast %45 : vector<64x32xbf16> to vector<4x16x32xbf16>
    %47 = tpu.concatenate %40, %42, %44, %46 in 0 : vector<4x16x32xbf16>, vector<4x16x32xbf16>, vector<4x16x32xbf16>, vector<4x16x32xbf16> -> vector<16x16x32xbf16>
    %48 = vector.extract_strided_slice %29 {offsets = [0, 256], sizes = [64, 32], strides = [1, 1]} : vector<64x384xbf16> to vector<64x32xbf16>
    %49 = vector.shape_cast %48 : vector<64x32xbf16> to vector<4x16x32xbf16>
    %50 = vector.extract_strided_slice %29 {offsets = [0, 288], sizes = [64, 32], strides = [1, 1]} : vector<64x384xbf16> to vector<64x32xbf16>
    %51 = vector.shape_cast %50 : vector<64x32xbf16> to vector<4x16x32xbf16>
    %52 = vector.extract_strided_slice %29 {offsets = [0, 320], sizes = [64, 32], strides = [1, 1]} : vector<64x384xbf16> to vector<64x32xbf16>
    %53 = vector.shape_cast %52 : vector<64x32xbf16> to vector<4x16x32xbf16>
    %54 = vector.extract_strided_slice %29 {offsets = [0, 352], sizes = [64, 32], strides = [1, 1]} : vector<64x384xbf16> to vector<64x32xbf16>
    %55 = vector.shape_cast %54 : vector<64x32xbf16> to vector<4x16x32xbf16>
    %56 = tpu.concatenate %49, %51, %53, %55 in 0 : vector<4x16x32xbf16>, vector<4x16x32xbf16>, vector<4x16x32xbf16>, vector<4x16x32xbf16> -> vector<16x16x32xbf16>
    "tpu.trace_start"() <{level = 10 : i32, message = "bnd,bmd->bnm"}> : () -> ()
    %cst_13 = arith.constant dense<0.000000e+00> : vector<16x16x16xf32>
    %57 = tpu.matmul %38, %47, %cst_13 {dimension_numbers = #tpu.dot_dimension_numbers<[2], [2], [1], [1], [0, 0, 0, 1, 1, 1], [0], [0]>} : vector<16x16x32xbf16>, vector<16x16x32xbf16>, vector<16x16x16xf32> -> vector<16x16x16xf32>
    "tpu.trace_stop"() : () -> ()
    %cst_14 = arith.constant dense<0xFF800000> : vector<16x16xf32>
    %58 = vector.multi_reduction <maximumf>, %57, %cst_14 [2] : vector<16x16x16xf32> to vector<16x16xf32>
    %59 = vector.shape_cast %58 : vector<16x16xf32> to vector<16x16x1xf32>
    %60 = vector.broadcast %59 : vector<16x16x1xf32> to vector<16x16x16xf32>
    %61 = arith.subf %57, %60 : vector<16x16x16xf32>
    %62 = math.exp %61 : vector<16x16x16xf32>
    %cst_15 = arith.constant dense<0.000000e+00> : vector<16x16xf32>
    %63 = vector.multi_reduction <add>, %62, %cst_15 [2] : vector<16x16x16xf32> to vector<16x16xf32>
    %64 = vector.shape_cast %63 : vector<16x16xf32> to vector<16x16x1xf32>
    %65 = tpu.reciprocal %64 {approx = true} : vector<16x16x1xf32> -> vector<16x16x1xf32>
    %66 = vector.broadcast %65 : vector<16x16x1xf32> to vector<16x16x16xf32>
    %67 = arith.mulf %62, %66 : vector<16x16x16xf32>
    %68 = arith.truncf %67 : vector<16x16x16xf32> to vector<16x16x16xbf16>
    "tpu.trace_start"() <{level = 10 : i32, message = "bnm,bmd->bnd"}> : () -> ()
    %cst_16 = arith.constant dense<0.000000e+00> : vector<16x16x32xf32>
    %69 = tpu.matmul %68, %56, %cst_16 {dimension_numbers = #tpu.dot_dimension_numbers<[2], [1], [1], [2], [0, 0, 0, 1, 1, 2], [0], [0]>} : vector<16x16x16xbf16>, vector<16x16x32xbf16>, vector<16x16x32xf32> -> vector<16x16x32xf32>
    "tpu.trace_stop"() : () -> ()
    %70 = arith.truncf %69 : vector<16x16x32xf32> to vector<16x16x32xbf16>
    %71 = vector.shape_cast %70 : vector<16x16x32xbf16> to vector<4x64x32xbf16>
    %c0_17 = arith.constant 0 : index
    %c0_18 = arith.constant 0 : index
    %c0_19 = arith.constant 0 : index
    %72 = vector.load %arg5[%c0_17, %c0_18, %c0_19] : memref<4x32x128xbf16, #tpu.memory_space<vmem>>, vector<4x32x128xbf16>
    "tpu.trace_start"() <{level = 10 : i32, message = "hmd,hdo->hmo"}> : () -> ()
    %cst_20 = arith.constant dense<0.000000e+00> : vector<4x64x128xf32>
    %73 = tpu.matmul %71, %72, %cst_20 {dimension_numbers = #tpu.dot_dimension_numbers<[2], [1], [1], [2], [0, 0, 0, 1, 1, 2], [0], [0]>} : vector<4x64x32xbf16>, vector<4x32x128xbf16>, vector<4x64x128xf32> -> vector<4x64x128xf32>
    "tpu.trace_stop"() : () -> ()
    %cst_21 = arith.constant dense<0.000000e+00> : vector<64x128xf32>
    %74 = vector.multi_reduction <add>, %73, %cst_21 [0] : vector<4x64x128xf32> to vector<64x128xf32>
    %c0_22 = arith.constant 0 : index
    %c0_23 = arith.constant 0 : index
    %75 = vector.load %arg6[%c0_22, %c0_23] : memref<1x128xf32, #tpu.memory_space<vmem>>, vector<1x128xf32>
    %76 = vector.broadcast %75 : vector<1x128xf32> to vector<64x128xf32>
    %77 = arith.addf %74, %76 : vector<64x128xf32>
    %78 = vector.shape_cast %77 : vector<64x128xf32> to vector<4x16x128xf32>
    %c0_24 = arith.constant 0 : index
    %c0_25 = arith.constant 0 : index
    %c0_26 = arith.constant 0 : index
    %79 = vector.load %arg7[%c0_24, %c0_25, %c0_26] : memref<4x16x128xf32, #tpu.memory_space<vmem>>, vector<4x16x128xf32>
    tpu.vector_store %arg7[%c0_24, %c0_25, %c0_26], %78 {strides = array<i32>} : memref<4x16x128xf32, #tpu.memory_space<vmem>>, vector<4x16x128xf32>,
    return
  }
  func.func @transform_0(%arg0: i32) -> (i32, i32, i32) {
    %c0_i32 = arith.constant 0 : i32
    %c0_i32_0 = arith.constant 0 : i32
    %c0_i32_1 = arith.constant 0 : i32
    return %arg0, %c0_i32, %c0_i32_0 : i32, i32, i32
  }
  func.func @transform_1(%arg0: i32) -> (i32, i32) {
    %c0_i32 = arith.constant 0 : i32
    %c0_i32_0 = arith.constant 0 : i32
    %c0_i32_1 = arith.constant 0 : i32
    return %c0_i32, %c0_i32_0 : i32, i32
  }
  func.func @transform_2(%arg0: i32) -> (i32, i32) {
    %c0_i32 = arith.constant 0 : i32
    %c0_i32_0 = arith.constant 0 : i32
    %c0_i32_1 = arith.constant 0 : i32
    return %c0_i32, %c0_i32_0 : i32, i32
  }
  func.func @transform_3(%arg0: i32) -> (i32, i32) {
    %c0_i32 = arith.constant 0 : i32
    %c0_i32_0 = arith.constant 0 : i32
    %c0_i32_1 = arith.constant 0 : i32
    return %c0_i32, %c0_i32_0 : i32, i32
  }
  func.func @transform_4(%arg0: i32) -> (i32, i32, i32) {
    %c0_i32 = arith.constant 0 : i32
    %c0_i32_0 = arith.constant 0 : i32
    %c0_i32_1 = arith.constant 0 : i32
    %c0_i32_2 = arith.constant 0 : i32
    return %c0_i32, %c0_i32_0, %c0_i32_1 : i32, i32, i32
  }
  func.func @transform_5(%arg0: i32) -> (i32, i32) {
    %c0_i32 = arith.constant 0 : i32
    %c0_i32_0 = arith.constant 0 : i32
    %c0_i32_1 = arith.constant 0 : i32
    return %c0_i32, %c0_i32_0 : i32, i32
  }
  func.func @transform_6(%arg0: i32) -> (i32, i32, i32) {
    %c0_i32 = arith.constant 0 : i32
    %c0_i32_0 = arith.constant 0 : i32
    %c0_i32_1 = arith.constant 0 : i32
    return %arg0, %c0_i32, %c0_i32_0 : i32, i32, i32
  }
}

</mosaic_0001>

<bundles_post_ra>
// kernel: tpu_custom_call.1
= control target key start
LH: loop header
LB: loop body
LE: loop exit
PB: predicated region body
PF: predicated region fallthrough
CT: control target
= control target key end

     0   :  { %11 = vsyncpa [#allocation3], 0  ;;  %s4453_s0 = inlined_call_operand.hbm [shape: f32[4,16,128], index: 0, kind: input, shape index: {}]   ;;  %s4454_s1 = inlined_call_operand.vmem [shape: f32[1,128], index: 1, kind: input, shape index: {}]   ;;  %s4455_s2 = inlined_call_operand.vmem [shape: f32[1,128], index: 2, kind: input, shape index: {}]   ;;  %s4456_s3 = inlined_call_operand.hbm [shape: bf16[128,384], index: 3, kind: input, shape index: {}]   ;;  %s4457_s4 = inlined_call_operand.hbm [shape: bf16[4,32,128], index: 4, kind: input, shape index: {}]   ;;  %s4458_s5 = inlined_call_operand.vmem [shape: f32[1,128], index: 5, kind: input, shape index: {}]   ;;  %s4459_s6 = inlined_call_operand.hbm [shape: f32[4,16,128], index: 6, kind: output, shape index: {}]  }
   0x1   :  { %12 = vsyncpa [#allocation6], 0 }
   0x2   :  { %13 = vsyncpa [#allocation4], 0  ;;  %s3661_s21 = smov [#allocation5]   ;;  %s3567_s25 = scalar_lea.hbm %s4456_s3, 3072 }
   0x3   :  { %s35_s22 = sshll.u32 %s3661_s21, 4  ;;  %p3568_p0 = scmp.ne.s32.totalorder %s4456_s3, %s3567_s25  ;;  %s36_s22 = int_to_ptr.vmem [resolvable:$true] %s35_s22 }
   0x4   :  { %p3571_p1 = scmp.lt.u32.totalorder %s3567_s25, %s4456_s3 }
   0x6   :  { %p3573_p2 = pnand %p3571_p1, %p3568_p0 }
   0x8   :  { %3576 = shalt.err (!%p3573_p2)
}
   0x9   :  { %s3577_s30 = scalar_lea.vmem %s36_s22, 3072  ;;  %p3582_p4 = scmp.lt.s32.totalorder %s36_s22, %s36_s22 }
   0xa   :  { %p3578_p3 = scmp.ne.s32.totalorder %s36_s22, %s3577_s30  ;;  %p3583_p5 = scmp.lt.s32.totalorder %s3577_s30, %s3577_s30 }
   0xc   :  { %p3584_p6 = por %p3583_p5, %p3582_p4 }
   0xe   :  { %p3585_p7 = pnand %p3584_p6, %p3578_p3 }
  0x10   :  { %3588 = shalt.err (!%p3585_p7)
}
  0x11   :  { %s3662_s7 = smov 192   ;;  %s3663_s8 = smov 12  }
  0x12   :  { %41 = dma.hbm_to_vmem [thread:$0]  %s4456_s3, 3072, %s36_s22, [#allocation6], %s3662_s7, %s3662_s7, %s3663_s8  }
  0x13   :  { %s3664_s11 = smov [#allocation2]   ;;  %s3589_s15 = scalar_lea.hbm %s4453_s0, 1024 }
  0x14   :  { %s19_s12 = sshll.u32 %s3664_s11, 4  ;;  %p3590_p8 = scmp.ne.s32.totalorder %s4453_s0, %s3589_s15  ;;  %s20_s12 = int_to_ptr.vmem [resolvable:$true] %s19_s12 }
  0x15   :  { %p3593_p9 = scmp.lt.u32.totalorder %s3589_s15, %s4453_s0 }
  0x17   :  { %p3595_p10 = pnand %p3593_p9, %p3590_p8 }
  0x19   :  { %3598 = shalt.err (!%p3595_p10)
}
  0x1a   :  { %s3599_s20 = scalar_lea.vmem %s20_s12, 1024  ;;  %p3604_p12 = scmp.lt.s32.totalorder %s20_s12, %s20_s12 }
  0x1b   :  { %p3600_p11 = scmp.ne.s32.totalorder %s20_s12, %s3599_s20  ;;  %p3605_p13 = scmp.lt.s32.totalorder %s3599_s20, %s3599_s20 }
  0x1d   :  { %p3606_p0 = por %p3605_p13, %p3604_p12 }
  0x1f   :  { %p3607_p1 = pnand %p3606_p0, %p3600_p11 }
  0x21   :  { %3610 = shalt.err (!%p3607_p1)
}
  0x22   :  { %s3665_s3 = smov 128   ;;  %s3666_s21 = smov 8  }
  0x23   :  { %25 = dma.hbm_to_vmem [thread:$0]  %s4453_s0, 1024, %s20_s12, [#allocation3], %s3665_s3, %s3665_s3, %s3666_s21  }
  0x24   :  { %s3667_s24 = smov [#allocation7]   ;;  %s3611_s28 = scalar_lea.hbm %s4457_s4, 1024 }
  0x25   :  { %s47_s25 = sshll.u32 %s3667_s24, 4  ;;  %p3612_p2 = scmp.ne.s32.totalorder %s4457_s4, %s3611_s28  ;;  %s48_s25 = int_to_ptr.vmem [resolvable:$true] %s47_s25 }
  0x26   :  { %p3615_p3 = scmp.lt.u32.totalorder %s3611_s28, %s4457_s4 }
  0x28   :  { %p3617_p4 = pnand %p3615_p3, %p3612_p2 }
  0x2a   :  { %3620 = shalt.err (!%p3617_p4)
}
  0x2b   :  { %s3621_s9 = scalar_lea.vmem %s48_s25, 1024  ;;  %p3626_p6 = scmp.lt.s32.totalorder %s48_s25, %s48_s25 }
  0x2c   :  { %p3622_p5 = scmp.ne.s32.totalorder %s48_s25, %s3621_s9  ;;  %p3627_p7 = scmp.lt.s32.totalorder %s3621_s9, %s3621_s9 }
  0x2e   :  { %p3628_p8 = por %p3627_p7, %p3626_p6 }
  0x30   :  { %p3629_p9 = pnand %p3628_p8, %p3622_p5 }
  0x32   :  { %3632 = shalt.err (!%p3629_p9)
}
  0x33   :  { %s3668_s0 = smov 64   ;;  %s3669_s10 = smov 4  }
  0x34   :  { %53 = dma.hbm_to_vmem [thread:$0]  %s4457_s4, 1024, %s48_s25, [#allocation6], %s3668_s0, %s3668_s0, %s3669_s10  }
  0x35   :  { %3655 = dma.done.wait [#allocation3], 1024  }
  0x36   :  { %3656 = vsyncadd [#allocation3], 4294966272 }
  0x37   :  { %3657 = dma.done.wait [#allocation6], 4096  }
  0x38   :  { %3658 = vsyncadd [#allocation6], 4294963200  ;;  %v3752_v0 = vld [vmem:[#allocation2] sm:$0xff]  ;;  %v3754_v1 = vld [vmem:[#allocation2 + $0x8] sm:$0xff]  ;;  %v3670_v33 = vmov 0   ;;  %vm3672_vm0 = vmmov 0  }
  0x39   :  { %74 = vadd.xlane.f32.xlu0 %v3752_v0  ;;  %v90_v2 = vmul.f32 %v3752_v0, %v3752_v0  ;;  %v91_v3 = vmul.f32 %v3754_v1, %v3754_v1  ;;  %v3383_v4 = vld [vmem:[#allocation5 + $0x4] ss:$12 sps:$4 sm:$0xff]   ;;  %v3764_v6 = vld [vmem:[#allocation2 + $0x18] sm:$0xff]  ;;  %v3385_v10 = vld [vmem:[#allocation5] ss:$12 sps:$4 sm:$0xff]   ;;  %404 = vmatprep.mubr.bf16.mxu1 %v3670_v33  ;;  %vm618_vm1 = vcmask 261120  }
  0x3a   :  { %v3761_v5 = vld [vmem:[#allocation2 + $0x10] sm:$0xff]  ;;  %372 = vmatprep.subr.bf16.mxu1 %v3383_v4  ;;  %v93_v8 = vmul.f32 %v3764_v6, %v3764_v6  ;;  %v3772_v9 = vld [vmem:[#allocation2 + $0x20] sm:$0xff]  ;;  %v3774_v11 = vld [vmem:[#allocation2 + $0x28] sm:$0xff]  ;;  %s3674_s15 = smov 32   ;;  %vm1371_vm2 = vcmask 130048   ;;  %s3675_s18 = smov [#allocation8]  }
  0x3b   :  { %98 = vadd.xlane.f32.xlu1 %v90_v2  ;;  %v92_v7 = vmul.f32 %v3761_v5, %v3761_v5  ;;  %373 = vmatpush1.bf16.msra.mxu1 %v3385_v10  ;;  %v3386_v12 = vld [vmem:[#allocation5 + $0x1c] ss:$12 sps:$4 sm:$0xff]   ;;  %v94_v13 = vmul.f32 %v3772_v9, %v3772_v9  ;;  %v3388_v14 = vld [vmem:[#allocation5 + $0x18] ss:$12 sps:$4 sm:$0xff]   ;;  %v95_v15 = vmul.f32 %v3774_v11, %v3774_v11  ;;  %v3389_v16 = vld [vmem:[#allocation5 + $0x34] ss:$12 sps:$4 sm:$0xff]  }
  0x3c   :  { %374 = vmatprep.subr.bf16.mxu1 %v3386_v12  ;;  %v3391_v17 = vld [vmem:[#allocation5 + $0x30] ss:$12 sps:$4 sm:$0xff]   ;;  %v3392_v20 = vld [vmem:[#allocation5 + $0x4c] ss:$12 sps:$4 sm:$0xff]   ;;  %v3394_v22 = vld [vmem:[#allocation5 + $0x48] ss:$12 sps:$4 sm:$0xff]  }
  0x3d   :  { %76 = vadd.xlane.f32.xlu0 %v3754_v1  ;;  %v3782_v18 = vld [vmem:[#allocation2 + $0x30] sm:$0xff]  ;;  %v3784_v19 = vld [vmem:[#allocation2 + $0x38] sm:$0xff]  ;;  %v3397_v25 = vld [vmem:[#allocation5 + $0x60] ss:$12 sps:$4 sm:$0xff]   ;;  %s2884_s19 = sshll.u32 %s3675_s18, 4  ;;  %s2885_s19 = int_to_ptr.vmem [resolvable:$true] %s2884_s19 }
  0x3e   :  { %v96_v21 = vmul.f32 %v3782_v18, %v3782_v18  ;;  %v97_v23 = vmul.f32 %v3784_v19, %v3784_v19  ;;  %v3395_v24 = vld [vmem:[#allocation5 + $0x64] ss:$12 sps:$4 sm:$0xff]   ;;  %v3398_v26 = vld [vmem:[#allocation5 + $0x7c] ss:$12 sps:$4 sm:$0xff]   ;;  %v3401_v28 = vld [vmem:[#allocation5 + $0x94] ss:$12 sps:$4 sm:$0xff]   ;;  %p3638_p11 = scmp.lt.s32.totalorder %s2885_s19, %s2885_s19 }
  0x3f   :  { %100 = vadd.xlane.f32.xlu1 %v91_v3  ;;  %375 = vmatpush1.bf16.msra.mxu1 %v3388_v14  ;;  %v3400_v27 = vld [vmem:[#allocation5 + $0x78] ss:$12 sps:$4 sm:$0xff]   ;;  %v3403_v29 = vld [vmem:[#allocation5 + $0x90] ss:$12 sps:$4 sm:$0xff]   ;;  %v3406_v31 = vld [vmem:[#allocation5 + $0xa8] ss:$12 sps:$4 sm:$0xff]  }
  0x40   :  { %376 = vmatprep.subr.bf16.mxu1 %v3389_v16  ;;  %v3404_v30 = vld [vmem:[#allocation5 + $0xac] ss:$12 sps:$4 sm:$0xff]   ;;  %v3792_v32 = vld [vmem:[#allocation5 + $0x8] ss:$12 sps:$4 sm:$0xff]   ;;  %v3806_v14 = vld [vmem:[%s4454_s1] ss:$0 sm:$0xff] }
  0x41   :  { %78 = vadd.xlane.f32.xlu0 %v3761_v5 }
  0x43   :  { %80 = vadd.xlane.f32.xlu1 %v3764_v6  ;;  %377 = vmatpush1.bf16.msra.mxu1 %v3391_v17 }
  0x44   :  { %378 = vmatprep.subr.bf16.mxu1 %v3392_v20 }
  0x45   :  { %102 = vadd.xlane.f32.xlu0 %v92_v7 }
  0x47   :  { %104 = vadd.xlane.f32.xlu1 %v93_v8  ;;  %379 = vmatpush1.bf16.msra.mxu1 %v3394_v22 }
  0x48   :  { %380 = vmatprep.subr.bf16.mxu1 %v3395_v24 }
  0x49   :  { %82 = vadd.xlane.f32.xlu0 %v3772_v9 }
  0x4b   :  { %84 = vadd.xlane.f32.xlu1 %v3774_v11  ;;  %381 = vmatpush1.bf16.msra.mxu1 %v3397_v25 }
  0x4c   :  { %382 = vmatprep.subr.bf16.mxu1 %v3398_v26 }
  0x4d   :  { %106 = vadd.xlane.f32.xlu0 %v94_v13 }
  0x4f   :  { %108 = vadd.xlane.f32.xlu1 %v95_v15  ;;  %383 = vmatpush1.bf16.msra.mxu1 %v3400_v27 }
  0x50   :  { %384 = vmatprep.subr.bf16.mxu1 %v3401_v28  ;;  %v3817_v28 = vld [vmem:[%s4455_s2] ss:$0 sm:$0xff]  ;;  %s3673_s2 = smov 96  }
  0x51   :  { %86 = vadd.xlane.f32.xlu0 %v3782_v18 }
  0x53   :  { %88 = vadd.xlane.f32.xlu1 %v3784_v19  ;;  %385 = vmatpush1.bf16.msra.mxu1 %v3403_v29 }
  0x54   :  { %386 = vmatprep.subr.bf16.mxu1 %v3404_v30 }
  0x55   :  { %110 = vadd.xlane.f32.xlu0 %v96_v21 }
  0x57   :  { %112 = vadd.xlane.f32.xlu1 %v97_v23  ;;  %387 = vmatpush1.bf16.msra.mxu1 %v3406_v31 }
  0x58   :  { %3080 = vmatprep.subr.bf16.mxu1 %v3792_v32 }
  0xc6   :  { %v75_v34 = vpop.xlane.xlu0 %74 }
  0xc7   :  { %v114_v35 = vmul.f32 0.0078125, %v75_v34 }
  0xc8   :  { %v99_v36 = vpop.xlane.xlu1 %98 }
  0xc9   :  { %v130_v37 = vmul.f32 %v114_v35, %v114_v35  ;;  %v122_v38 = vmul.f32 0.0078125, %v99_v36  ;;  %v146_v63 = vsub.f32 %v3752_v0, %v114_v35 }
  0xca   :  { %v77_v39 = vpop.xlane.xlu0 %76 }
  0xcb   :  { %v138_v40 = vsub.f32 %v122_v38, %v130_v37  ;;  %v115_v41 = vmul.f32 0.0078125, %v77_v39 }
  0xcc   :  { %v101_v42 = vpop.xlane.xlu1 %100 }
  0xcd   :  { %v154_v43 = vadd.f32 1e-05, %v138_v40  ;;  %v131_v44 = vmul.f32 %v115_v41, %v115_v41  ;;  %v123_v45 = vmul.f32 0.0078125, %v101_v42  ;;  %v147_v0 = vsub.f32 %v3754_v1, %v115_v41 }
  0xce   :  { %v79_v46 = vpop.xlane.xlu0 %78 }
  0xcf   :  { %3423 = vrsqrt.f32 %v154_v43  ;;  %v139_v47 = vsub.f32 %v123_v45, %v131_v44  ;;  %v116_v48 = vmul.f32 0.0078125, %v79_v46  ;;  %v3408_v44 = vld [vmem:[#allocation5 + $0x20] ss:$12 sps:$4 sm:$0xff]  }
  0xd0   :  { %v81_v49 = vpop.xlane.xlu1 %80 }
  0xd1   :  { %v155_v50 = vadd.f32 1e-05, %v139_v47  ;;  %v132_v51 = vmul.f32 %v116_v48, %v116_v48  ;;  %v117_v52 = vmul.f32 0.0078125, %v81_v49  ;;  %v148_v34 = vsub.f32 %v3761_v5, %v116_v48 }
  0xd2   :  { %v103_v53 = vpop.xlane.xlu0 %102 }
  0xd3   :  { %3425 = vrsqrt.f32 %v155_v50  ;;  %v124_v54 = vmul.f32 0.0078125, %v103_v53  ;;  %v133_v56 = vmul.f32 %v117_v52, %v117_v52  ;;  %v149_v41 = vsub.f32 %v3764_v6, %v117_v52  ;;  %v3409_v52 = vld [vmem:[#allocation5 + $0x38] ss:$12 sps:$4 sm:$0xff]  }
  0xd4   :  { %v105_v55 = vpop.xlane.xlu1 %104 }
  0xd5   :  { %v140_v57 = vsub.f32 %v124_v54, %v132_v51  ;;  %v125_v58 = vmul.f32 0.0078125, %v105_v55 }
  0xd6   :  { %v83_v59 = vpop.xlane.xlu0 %82 }
  0xd7   :  { %v156_v60 = vadd.f32 1e-05, %v140_v57  ;;  %v141_v61 = vsub.f32 %v125_v58, %v133_v56  ;;  %v3796_v62 = vmul.f32 0.0078125, %v83_v59 }
  0xd8   :  { %v85_v2 = vpop.xlane.xlu1 %84 }
  0xd9   :  { %v3424_v3 = vpop.eup %3423  ;;  %3427 = vrsqrt.f32 %v156_v60  ;;  %v157_v4 = vadd.f32 1e-05, %v141_v61  ;;  %v134_v7 = vmul.f32 %v3796_v62, %v3796_v62  ;;  %v3801_v8 = vmul.f32 0.0078125, %v85_v2  ;;  %v3410_v60 = vld [vmem:[#allocation5 + $0x50] ss:$12 sps:$4 sm:$0xff]  }
  0xda   :  { %v107_v10 = vpop.xlane.xlu0 %106  ;;  %v170_v12 = vmul.f32 %v3424_v3, %v146_v63  ;;  %v150_v55 = vsub.f32 %v3772_v9, %v3796_v62  ;;  %v3411_v62 = vld [vmem:[#allocation5 + $0x68] ss:$12 sps:$4 sm:$0xff]  }
  0xdb   :  { %3429 = vrsqrt.f32 %v157_v4  ;;  %v126_v13 = vmul.f32 0.0078125, %v107_v10  ;;  %v135_v17 = vmul.f32 %v3801_v8, %v3801_v8 }
  0xdc   :  { %v109_v15 = vpop.xlane.xlu1 %108  ;;  %v185_v24 = vmul.f32 %v3806_v14, %v170_v12 }
  0xdd   :  { %v3426_v16 = vpop.eup %3425  ;;  %v142_v20 = vsub.f32 %v126_v13, %v134_v7  ;;  %v127_v21 = vmul.f32 0.0078125, %v109_v15  ;;  %v3412_v13 = vld [vmem:[#allocation5 + $0x80] ss:$12 sps:$4 sm:$0xff]  }
  0xde   :  { %v87_v22 = vpop.xlane.xlu0 %86  ;;  %v171_v23 = vmul.f32 %v3426_v16, %v147_v0  ;;  %v200_v37 = vadd.f32 %v3817_v28, %v185_v24 }
  0xdf   :  { %v158_v25 = vadd.f32 1e-05, %v142_v20  ;;  %v143_v26 = vsub.f32 %v127_v21, %v135_v17  ;;  %v3812_v27 = vmul.f32 0.0078125, %v87_v22  ;;  %v3413_v20 = vld [vmem:[#allocation5 + $0x98] ss:$12 sps:$4 sm:$0xff]  }
  0xe0   :  { %v89_v1 = vpop.xlane.xlu1 %88  ;;  %v186_v29 = vmul.f32 %v3806_v14, %v171_v23  ;;  %v3414_v23 = vld [vmem:[#allocation5 + $0xb0] ss:$12 sps:$4 sm:$0xff]  }
  0xe1   :  { %3431 = vrsqrt.f32 %v158_v25  ;;  %v159_v30 = vadd.f32 1e-05, %v143_v26  ;;  %v136_v31 = vmul.f32 %v3812_v27, %v3812_v27  ;;  %v121_v35 = vmul.f32 0.0078125, %v89_v1 }
  0xe2   :  { %v111_v36 = vpop.xlane.xlu0 %110  ;;  %v201_v38 = vadd.f32 %v3817_v28, %v186_v29  ;;  %v152_v4 = vsub.f32 %v3782_v18, %v3812_v27 }
  0xe3   :  { %v3428_v39 = vpop.eup %3427  ;;  %3433 = vrsqrt.f32 %v159_v30  ;;  %v128_v40 = vmul.f32 0.0078125, %v111_v36  ;;  %v137_v47 = vmul.f32 %v121_v35, %v121_v35  ;;  %v153_v10 = vsub.f32 %v3784_v19, %v121_v35 }
  0xe4   :  { %v113_v42 = vpop.xlane.xlu1 %112  ;;  %v3826_v43 = vpack.c.bf16 %v201_v38, %v200_v37  ;;  %v172_v45 = vmul.f32 %v3428_v39, %v148_v34 }
  0xe5   :  { %v3430_v46 = vpop.eup %3429  ;;  %v144_v49 = vsub.f32 %v128_v40, %v136_v31  ;;  %v129_v5 = vmul.f32 0.0078125, %v113_v42 }
  0xe6   :  { %405 = vmatmul.mubr.bf16.vlgmr.msra.gmra.mrb[0].mxu1 %v3826_v43  ;;  %v173_v48 = vmul.f32 %v3430_v46, %v149_v41  ;;  %v187_v50 = vmul.f32 %v3806_v14, %v172_v45 }
  0xe7   :  { %v160_v51 = vadd.f32 1e-05, %v144_v49  ;;  %v145_v53 = vsub.f32 %v129_v5, %v137_v47  ;;  %3081 = vmatpush3.bf16.msra.mxu1 %v3792_v32  ;;  %414 = vmatprep.mubr.bf16.mxu1 %v3670_v33  ;;  %v151_v32 = vsub.f32 %v3774_v11, %v3801_v8 }
  0xe8   :  { %3082 = vmatprep.subr.bf16.mxu1 %v3408_v44  ;;  %v188_v6 = vmul.f32 %v3806_v14, %v173_v48  ;;  %v202_v56 = vadd.f32 %v3817_v28, %v187_v50 }
  0xe9   :  { %3435 = vrsqrt.f32 %v160_v51  ;;  %v161_v54 = vadd.f32 1e-05, %v145_v53 }
  0xea   :  { %v203_v57 = vadd.f32 %v3817_v28, %v188_v6 }
  0xeb   :  { %v3432_v58 = vpop.eup %3431  ;;  %3437 = vrsqrt.f32 %v161_v54  ;;  %3083 = vmatpush3.bf16.msra.mxu1 %v3408_v44 }
  0xec   :  { %v209_v59 = vpack.c.bf16 %v203_v57, %v202_v56  ;;  %3084 = vmatprep.subr.bf16.mxu1 %v3409_v52  ;;  %v174_v61 = vmul.f32 %v3432_v58, %v150_v55 }
  0xed   :  { %v3434_v63 = vpop.eup %3433 }
  0xee   :  { %415 = vmatmul.mubr.bf16.gmra.mrb[4].mxu1 %v209_v59  ;;  %v175_v2 = vmul.f32 %v3434_v63, %v151_v32  ;;  %v189_v3 = vmul.f32 %v3806_v14, %v174_v61 }
  0xef   :  { %3085 = vmatpush3.bf16.msra.mxu1 %v3409_v52  ;;  %424 = vmatprep.mubr.bf16.mxu1 %v3670_v33 }
  0xf0   :  { %3086 = vmatprep.subr.bf16.mxu1 %v3410_v60  ;;  %v190_v9 = vmul.f32 %v3806_v14, %v175_v2  ;;  %v204_v11 = vadd.f32 %v3817_v28, %v189_v3 }
  0xf2   :  { %v205_v7 = vadd.f32 %v3817_v28, %v190_v9 }
  0xf3   :  { %v3436_v8 = vpop.eup %3435  ;;  %3087 = vmatpush3.bf16.msra.mxu1 %v3410_v60 }
  0xf4   :  { %v210_v12 = vpack.c.bf16 %v205_v7, %v204_v11  ;;  %3088 = vmatprep.subr.bf16.mxu1 %v3411_v62  ;;  %v176_v0 = vmul.f32 %v3436_v8, %v152_v4 }
  0xf5   :  { %v3438_v15 = vpop.eup %3437 }
  0xf6   :  { %425 = vmatmul.mubr.bf16.gmra.mrb[8].mxu1 %v210_v12  ;;  %v177_v16 = vmul.f32 %v3438_v15, %v153_v10  ;;  %v191_v17 = vmul.f32 %v3806_v14, %v176_v0 }
  0xf7   :  { %3089 = vmatpush3.bf16.msra.mxu1 %v3411_v62  ;;  %434 = vmatprep.mubr.bf16.mxu1 %v3670_v33  ;;  %v3671_v33 = vmov 0.0  }
  0xf8   :  { %3090 = vmatprep.subr.bf16.mxu1 %v3412_v13  ;;  %v192_v18 = vmul.f32 %v3806_v14, %v177_v16  ;;  %v206_v21 = vadd.f32 %v3817_v28, %v191_v17  ;;  %3104 = vmatprep.subr.bf16.mxu0 %v3671_v33 }
  0xf9   :  { %3106 = vmatprep.mubr.msk.bf16.mxu0 %vm3672_vm0, %v3671_v33 }
  0xfa   :  { %v207_v19 = vadd.f32 %v3817_v28, %v192_v18 }
  0xfb   :  { %3091 = vmatpush3.bf16.msra.mxu1 %v3412_v13 }
  0xfc   :  { %v211_v22 = vpack.c.bf16 %v207_v19, %v206_v21  ;;  %3092 = vmatprep.subr.bf16.mxu1 %v3413_v20 }
  0xfe   :  { %435 = vmatmul.mubr.bf16.gmra.mrb[12].mxu1 %v211_v22 }
  0xff   :  { %3093 = vmatpush3.bf16.msra.mxu1 %v3413_v20  ;;  %3096 = vmatprep.mubr.bf16.mxu1 %v3826_v43 }
 0x100   :  { %3094 = vmatprep.subr.bf16.mxu1 %v3414_v23 }
 0x103   :  { %3095 = vmatpush3.bf16.msra.mxu1 %v3414_v23 }
 0x104   :  { %3110 = vmatprep.subr.bf16.mxu1 %v3671_v33 }
 0x106   :  { %3097 = vmatmul.mubr.bf16.vlgmr.msra.gmra.mrb[16].mxu1 %v209_v59 }
 0x107   :  { %3100 = vmatprep.mubr.bf16.mxu1 %v210_v12 }
 0x10e   :  { %3101 = vmatmul.mubr.bf16.gmra.mrb[20].mxu1 %v211_v22 }
 0x10f   :  { %3112 = vmatprep.mubr.msk.bf16.mxu1 %vm3672_vm0, %v3671_v33 }
 0x1b9   :  { %v406_v14 = vpop.f32.mrb[0].mxu1 }
 0x1ba   :  { %v408_v24 = vpop.f32.mrb[1].mxu1 }
 0x1bb   :  { %v410_v25 = vpop.f32.mrb[2].mxu1 }
 0x1bc   :  { %v3859_v26 = vpack.c.bf16 %v410_v25, %v406_v14  ;;  %v412_v27 = vpop.f32.mrb[3].mxu1 }
 0x1bd   :  { %v3861_v28 = vpack.c.bf16 %v412_v27, %v408_v24 }
 0x1be   :  { %526 = vrot.lane.b32.xlu1 %v3859_v26, %s3673_s2 }
 0x1bf   :  { %554 = vrot.lane.b32.xlu0 %v3861_v28, %s3673_s2  ;;  %v623_v1 = vsel %vm618_vm1, %v3861_v28, 0 }
 0x1c0   :  { %3105 = vmatpush3.bf16.xpose.msra.mxu0 %v623_v1 }
 0x1c1   :  { %v416_v29 = vpop.f32.mrb[4].mxu1  ;;  %3116 = vmatprep.subr.bf16.mxu0 %v3671_v33 }
 0x1c2   :  { %v418_v30 = vpop.f32.mrb[5].mxu1 }
 0x1c3   :  { %v420_v31 = vpop.f32.mrb[6].mxu1 }
 0x1c4   :  { %v513_v34 = vpack.c.bf16 %v420_v31, %v416_v29  ;;  %v422_v35 = vpop.f32.mrb[7].mxu1 }
 0x1c5   :  { %v514_v36 = vpack.c.bf16 %v422_v35, %v418_v30 }
 0x1c6   :  { %528 = vrot.lane.b32.xlu0 %v513_v34, %s3673_s2 }
 0x1c7   :  { %3107 = vmatmul.mubr.msk.bf16.vlgmr.msra.gmra.mrb[0].mxu0 %vm618_vm1, %v3859_v26  ;;  %556 = vrot.lane.b32.xlu1 %v514_v36, %s3673_s2  ;;  %v670_v37 = vsel %vm618_vm1, %v514_v36, 0 }
 0x1c8   :  { %3111 = vmatpush3.bf16.xpose.msra.mxu1 %v670_v37  ;;  %3118 = vmatprep.mubr.msk.bf16.mxu0 %vm3672_vm0, %v3671_v33 }
 0x1c9   :  { %v426_v38 = vpop.f32.mrb[8].mxu1  ;;  %3122 = vmatprep.subr.bf16.mxu1 %v3671_v33 }
 0x1ca   :  { %v428_v39 = vpop.f32.mrb[9].mxu1 }
 0x1cb   :  { %v430_v40 = vpop.f32.mrb[10].mxu1 }
 0x1cc   :  { %v516_v41 = vpack.c.bf16 %v430_v40, %v426_v38  ;;  %v432_v42 = vpop.f32.mrb[11].mxu1 }
 0x1cd   :  { %v517_v43 = vpack.c.bf16 %v432_v42, %v428_v39 }
 0x1ce   :  { %530 = vrot.lane.b32.xlu0 %v516_v41, %s3673_s2 }
 0x1cf   :  { %558 = vrot.lane.b32.xlu1 %v517_v43, %s3673_s2  ;;  %3113 = vmatmul.mubr.msk.bf16.vlgmr.msra.gmra.mrb[24].mxu1 %vm618_vm1, %v513_v34  ;;  %v717_v44 = vsel %vm618_vm1, %v517_v43, 0 }
 0x1d0   :  { %3117 = vmatpush3.bf16.xpose.msra.mxu0 %v717_v44  ;;  %3124 = vmatprep.mubr.msk.bf16.mxu1 %vm3672_vm0, %v3671_v33 }
 0x1d1   :  { %v436_v45 = vpop.f32.mrb[12].mxu1  ;;  %3128 = vmatprep.subr.bf16.mxu0 %v3671_v33 }
 0x1d2   :  { %v438_v46 = vpop.f32.mrb[13].mxu1 }
 0x1d3   :  { %v440_v47 = vpop.f32.mrb[14].mxu1 }
 0x1d4   :  { %v519_v49 = vpack.c.bf16 %v440_v47, %v436_v45  ;;  %v442_v5 = vpop.f32.mrb[15].mxu1 }
 0x1d5   :  { %v520_v48 = vpack.c.bf16 %v442_v5, %v438_v46 }
 0x1d6   :  { %532 = vrot.lane.b32.xlu0 %v519_v49, %s3673_s2 }
 0x1d7   :  { %3119 = vmatmul.mubr.msk.bf16.vlgmr.msra.gmra.mrb[4].mxu0 %vm618_vm1, %v516_v41  ;;  %560 = vrot.lane.b32.xlu1 %v520_v48, %s3673_s2  ;;  %v764_v50 = vsel %vm618_vm1, %v520_v48, 0 }
 0x1d8   :  { %3123 = vmatpush3.bf16.xpose.msra.mxu1 %v764_v50  ;;  %3130 = vmatprep.mubr.msk.bf16.mxu0 %vm3672_vm0, %v3671_v33 }
 0x1d9   :  { %v3098_v51 = vpop.f32.mrb[16].mxu1  ;;  %3134 = vmatprep.subr.bf16.mxu1 %v3671_v33 }
 0x1da   :  { %534 = vrot.lane.b32.xlu0 %v3859_v26, %s3668_s0  ;;  %v479_v53 = vpop.f32.mrb[17].mxu1 }
 0x1db   :  { %562 = vrot.lane.b32.xlu1 %v3861_v28, %s3668_s0  ;;  %v3099_v6 = vpop.f32.mrb[18].mxu1 }
 0x1dc   :  { %v3896_v52 = vpack.c.bf16 %v3099_v6, %v3098_v51  ;;  %v482_v54 = vpop.f32.mrb[19].mxu1 }
 0x1dd   :  { %v3898_v55 = vpack.c.bf16 %v482_v54, %v479_v53 }
 0x1de   :  { %536 = vrot.lane.b32.xlu0 %v513_v34, %s3668_s0 }
 0x1df   :  { %564 = vrot.lane.b32.xlu1 %v514_v36, %s3668_s0  ;;  %3125 = vmatmul.mubr.msk.bf16.vlgmr.msra.gmra.mrb[28].mxu1 %vm618_vm1, %v519_v49 }
 0x1e0   :  { %3136 = vmatprep.mubr.msk.bf16.mxu1 %vm3672_vm0, %v3671_v33 }
 0x1e1   :  { %v3102_v56 = vpop.f32.mrb[20].mxu1 }
 0x1e2   :  { %538 = vrot.lane.b32.xlu0 %v516_v41, %s3668_s0  ;;  %v495_v57 = vpop.f32.mrb[21].mxu1 }
 0x1e3   :  { %566 = vrot.lane.b32.xlu1 %v517_v43, %s3668_s0  ;;  %v3103_v58 = vpop.f32.mrb[22].mxu1 }
 0x1e4   :  { %v3907_v32 = vpack.c.bf16 %v3103_v58, %v3102_v56  ;;  %v498_v59 = vpop.f32.mrb[23].mxu1 }
 0x1e5   :  { %v3909_v60 = vpack.c.bf16 %v498_v59, %v495_v57 }
 0x1e6   :  { %540 = vrot.lane.b32.xlu0 %v519_v49, %s3668_s0 }
 0x1e7   :  { %568 = vrot.lane.b32.xlu1 %v520_v48, %s3668_s0 }
 0x1ea   :  { %542 = vrot.lane.b32.xlu0 %v3859_v26, %s3674_s15 }
 0x1eb   :  { %570 = vrot.lane.b32.xlu1 %v3861_v28, %s3674_s15 }
 0x1ee   :  { %544 = vrot.lane.b32.xlu0 %v513_v34, %s3674_s15 }
 0x1ef   :  { %572 = vrot.lane.b32.xlu1 %v514_v36, %s3674_s15 }
 0x1f2   :  { %546 = vrot.lane.b32.xlu0 %v516_v41, %s3674_s15 }
 0x1f3   :  { %574 = vrot.lane.b32.xlu1 %v517_v43, %s3674_s15 }
 0x1f6   :  { %582 = vrot.lane.b32.xlu0 %v3898_v55, %s3673_s2 }
 0x1f7   :  { %576 = vrot.lane.b32.xlu1 %v520_v48, %s3674_s15 }
 0x1fa   :  { %594 = vrot.lane.b32.xlu0 %v3898_v55, %s3668_s0 }
 0x1fb   :  { %548 = vrot.lane.b32.xlu1 %v519_v49, %s3674_s15 }
 0x1fe   :  { %586 = vrot.lane.b32.xlu0 %v3909_v60, %s3673_s2 }
 0x1ff   :  { %584 = vrot.lane.b32.xlu1 %v3896_v52, %s3673_s2 }
 0x203   :  { %596 = vrot.lane.b32.xlu1 %v3896_v52, %s3668_s0 }
 0x207   :  { %588 = vrot.lane.b32.xlu1 %v3907_v32, %s3673_s2 }
 0x20b   :  { %600 = vrot.lane.b32.xlu1 %v3907_v32, %s3668_s0 }
 0x20f   :  { %598 = vrot.lane.b32.xlu1 %v3909_v60, %s3668_s0 }
 0x230   :  { %v527_v2 = vpop.permute.xlu1 %526 }
 0x231   :  { %v555_v61 = vpop.permute.xlu0 %554 }
 0x232   :  { %v811_v63 = vsel %vm618_vm1, %v555_v61, 0 }
 0x233   :  { %3129 = vmatpush3.bf16.xpose.msra.mxu0 %v811_v63 }
 0x234   :  { %3140 = vmatprep.subr.bf16.mxu0 %v3671_v33 }
 0x238   :  { %v529_v62 = vpop.permute.xlu0 %528 }
 0x239   :  { %v557_v3 = vpop.permute.xlu1 %556 }
 0x23a   :  { %v858_v9 = vsel %vm618_vm1, %v557_v3, 0  ;;  %3131 = vmatmul.mubr.msk.bf16.vlgmr.msra.gmra.mrb[8].mxu0 %vm618_vm1, %v527_v2 }
 0x23b   :  { %3135 = vmatpush3.bf16.xpose.msra.mxu1 %v858_v9  ;;  %3142 = vmatprep.mubr.msk.bf16.mxu0 %vm3672_vm0, %v3671_v33 }
 0x23c   :  { %3146 = vmatprep.subr.bf16.mxu1 %v3671_v33 }
 0x240   :  { %v531_v7 = vpop.permute.xlu0 %530 }
 0x241   :  { %v559_v4 = vpop.permute.xlu1 %558 }
 0x242   :  { %v905_v11 = vsel %vm618_vm1, %v559_v4, 0  ;;  %3137 = vmatmul.mubr.msk.bf16.vlgmr.msra.gmra.mrb[32].mxu1 %vm618_vm1, %v529_v62 }
 0x243   :  { %3141 = vmatpush3.bf16.xpose.msra.mxu0 %v905_v11  ;;  %3148 = vmatprep.mubr.msk.bf16.mxu1 %vm3672_vm0, %v3671_v33 }
 0x244   :  { %3152 = vmatprep.subr.bf16.mxu0 %v3671_v33 }
 0x248   :  { %v533_v8 = vpop.permute.xlu0 %532 }
 0x249   :  { %v561_v10 = vpop.permute.xlu1 %560 }
 0x24a   :  { %v952_v12 = vsel %vm618_vm1, %v561_v10, 0  ;;  %3143 = vmatmul.mubr.msk.bf16.vlgmr.msra.gmra.mrb[12].mxu0 %vm618_vm1, %v531_v7 }
 0x24b   :  { %3147 = vmatpush3.bf16.xpose.msra.mxu1 %v952_v12  ;;  %3154 = vmatprep.mubr.msk.bf16.mxu0 %vm3672_vm0, %v3671_v33 }
 0x24c   :  { %v535_v13 = vpop.permute.xlu0 %534  ;;  %3158 = vmatprep.subr.bf16.mxu1 %v3671_v33 }
 0x24d   :  { %v563_v0 = vpop.permute.xlu1 %562 }
 0x24e   :  { %v999_v15 = vsel %vm618_vm1, %v563_v0, 0 }
 0x24f   :  { %3153 = vmatpush3.bf16.xpose.msra.mxu0 %v999_v15 }
 0x250   :  { %v537_v16 = vpop.permute.xlu0 %536  ;;  %3164 = vmatprep.subr.bf16.mxu0 %v3671_v33 }
 0x251   :  { %v565_v17 = vpop.permute.xlu1 %564 }
 0x252   :  { %v1046_v18 = vsel %vm618_vm1, %v565_v17, 0  ;;  %3149 = vmatmul.mubr.msk.bf16.vlgmr.msra.gmra.mrb[36].mxu1 %vm618_vm1, %v533_v8 }
 0x253   :  { %3159 = vmatpush3.bf16.xpose.msra.mxu1 %v1046_v18  ;;  %3160 = vmatprep.mubr.msk.bf16.mxu1 %vm3672_vm0, %v3671_v33 }
 0x254   :  { %3170 = vmatprep.subr.bf16.mxu1 %v3671_v33  ;;  %v539_v20 = vpop.permute.xlu0 %538 }
 0x255   :  { %v567_v21 = vpop.permute.xlu1 %566 }
 0x256   :  { %v1093_v19 = vsel %vm618_vm1, %v567_v21, 0  ;;  %3155 = vmatmul.mubr.msk.bf16.vlgmr.msra.gmra.mrb[16].mxu0 %vm618_vm1, %v535_v13 }
 0x257   :  { %3165 = vmatpush3.bf16.xpose.msra.mxu0 %v1093_v19  ;;  %3166 = vmatprep.mubr.msk.bf16.mxu0 %vm3672_vm0, %v3671_v33 }
 0x258   :  { %3176 = vmatprep.subr.bf16.mxu0 %v3671_v33  ;;  %v541_v14 = vpop.permute.xlu0 %540 }
 0x259   :  { %v569_v22 = vpop.permute.xlu1 %568 }
 0x25a   :  { %v1140_v23 = vsel %vm618_vm1, %v569_v22, 0  ;;  %3161 = vmatmul.mubr.msk.bf16.vlgmr.msra.gmra.mrb[40].mxu1 %vm618_vm1, %v537_v16 }
 0x25b   :  { %3171 = vmatpush3.bf16.xpose.msra.mxu1 %v1140_v23  ;;  %3172 = vmatprep.mubr.msk.bf16.mxu1 %vm3672_vm0, %v3671_v33 }
 0x25c   :  { %3182 = vmatprep.subr.bf16.mxu1 %v3671_v33  ;;  %v543_v26 = vpop.permute.xlu0 %542 }
 0x25d   :  { %v571_v24 = vpop.permute.xlu1 %570 }
 0x25e   :  { %v1187_v25 = vsel %vm618_vm1, %v571_v24, 0  ;;  %3167 = vmatmul.mubr.msk.bf16.vlgmr.msra.gmra.mrb[20].mxu0 %vm618_vm1, %v539_v20 }
 0x25f   :  { %3177 = vmatpush3.bf16.xpose.msra.mxu0 %v1187_v25  ;;  %3178 = vmatprep.mubr.msk.bf16.mxu0 %vm3672_vm0, %v3671_v33 }
 0x260   :  { %3188 = vmatprep.subr.bf16.mxu0 %v3671_v33  ;;  %v545_v30 = vpop.permute.xlu0 %544 }
 0x261   :  { %v573_v27 = vpop.permute.xlu1 %572 }
 0x262   :  { %v1234_v28 = vsel %vm618_vm1, %v573_v27, 0  ;;  %3173 = vmatmul.mubr.msk.bf16.vlgmr.msra.gmra.mrb[44].mxu1 %vm618_vm1, %v541_v14 }
 0x263   :  { %3183 = vmatpush3.bf16.xpose.msra.mxu1 %v1234_v28  ;;  %3184 = vmatprep.mubr.msk.bf16.mxu1 %vm3672_vm0, %v3671_v33 }
 0x264   :  { %3194 = vmatprep.subr.bf16.mxu1 %v3671_v33  ;;  %v547_v35 = vpop.permute.xlu0 %546 }
 0x265   :  { %v575_v1 = vpop.permute.xlu1 %574 }
 0x266   :  { %v1281_v29 = vsel %vm618_vm1, %v575_v1, 0  ;;  %3179 = vmatmul.mubr.msk.bf16.vlgmr.msra.gmra.mrb[24].mxu0 %vm618_vm1, %v543_v26 }
 0x267   :  { %3189 = vmatpush3.bf16.xpose.msra.mxu0 %v1281_v29  ;;  %3190 = vmatprep.mubr.msk.bf16.mxu0 %vm3672_vm0, %v3671_v33 }
 0x268   :  { %3200 = vmatprep.subr.bf16.mxu0 %v3671_v33  ;;  %v4055_v16 = vpop.permute.xlu0 %582 }
 0x269   :  { %v577_v31 = vpop.permute.xlu1 %576 }
 0x26a   :  { %v1328_v34 = vsel %vm618_vm1, %v577_v31, 0  ;;  %3185 = vmatmul.mubr.msk.bf16.vlgmr.msra.gmra.mrb[48].mxu1 %vm618_vm1, %v545_v30 }
 0x26b   :  { %3195 = vmatpush3.bf16.xpose.msra.mxu1 %v1328_v34  ;;  %3196 = vmatprep.mubr.msk.bf16.mxu1 %vm3672_vm0, %v3671_v33 }
 0x26c   :  { %3206 = vmatprep.subr.bf16.mxu1 %v3671_v33  ;;  %v4063_v19 = vpop.permute.xlu0 %594 }
 0x26d   :  { %v549_v36 = vpop.permute.xlu1 %548 }
 0x26e   :  { %3191 = vmatmul.mubr.msk.bf16.vlgmr.msra.gmra.mrb[28].mxu0 %vm618_vm1, %v547_v35 }
 0x26f   :  { %3201 = vmatpush3.bf16.msra.mxu0 %v3898_v55  ;;  %3202 = vmatprep.mubr.msk.bf16.mxu0 %vm3672_vm0, %v3671_v33 }
 0x270   :  { %3212 = vmatprep.subr.bf16.mxu0 %v3671_v33  ;;  %v4071_v25 = vpop.permute.xlu0 %586 }
 0x271   :  { %v4039_v9 = vpop.permute.xlu1 %584 }
 0x272   :  { %3197 = vmatmul.mubr.msk.bf16.vlgmr.msra.gmra.mrb[52].mxu1 %vm618_vm1, %v549_v36 }
 0x273   :  { %3207 = vmatpush3.bf16.msra.mxu1 %v3896_v52  ;;  %3208 = vmatprep.mubr.msk.bf16.mxu1 %vm3672_vm0, %v3671_v33 }
 0x274   :  { %3218 = vmatprep.subr.bf16.mxu1 %v3671_v33 }
 0x275   :  { %v4045_v7 = vpop.permute.xlu1 %596 }
 0x279   :  { %v4057_v17 = vpop.permute.xlu1 %588 }
 0x27d   :  { %v4069_v24 = vpop.permute.xlu1 %600 }
 0x281   :  { %v4077_v1 = vpop.permute.xlu1 %598 }
 0x29a   :  { %v4003_v37 = vpop.f32.mrb[0].mxu0 }
 0x29b   :  { %v3108_v38 = vpop.f32.mrb[1].mxu0  ;;  %v1372_v39 = vsel %vm1371_vm2, %v4003_v37, -inf }
 0x29c   :  { %v4007_v40 = vpop.f32.mrb[2].mxu0  ;;  %1373 = vmax.xlane.f32.xlu0 %v1372_v39 }
 0x29d   :  { %v3109_v41 = vpop.f32.mrb[3].mxu0  ;;  %v1375_v42 = vsel %vm1371_vm2, %v4007_v40, -inf }
 0x29e   :  { %1376 = vmax.xlane.f32.xlu1 %v1375_v42 }
 0x2a2   :  { %v4011_v43 = vpop.f32.mrb[24].mxu1 }
 0x2a3   :  { %v3114_v44 = vpop.f32.mrb[25].mxu1  ;;  %v1378_v45 = vsel %vm1371_vm2, %v4011_v43, -inf }
 0x2a4   :  { %v4015_v46 = vpop.f32.mrb[26].mxu1  ;;  %1379 = vmax.xlane.f32.xlu0 %v1378_v45 }
 0x2a5   :  { %v3115_v47 = vpop.f32.mrb[27].mxu1  ;;  %v1381_v49 = vsel %vm1371_vm2, %v4015_v46, -inf }
 0x2a8   :  { %1382 = vmax.xlane.f32.xlu0 %v1381_v49 }
 0x2aa   :  { %v4019_v5 = vpop.f32.mrb[4].mxu0 }
 0x2ab   :  { %v3120_v48 = vpop.f32.mrb[5].mxu0  ;;  %v1384_v50 = vsel %vm1371_vm2, %v4019_v5, -inf }
 0x2ac   :  { %v4023_v51 = vpop.f32.mrb[6].mxu0  ;;  %1385 = vmax.xlane.f32.xlu0 %v1384_v50 }
 0x2ad   :  { %v3121_v53 = vpop.f32.mrb[7].mxu0  ;;  %v1387_v6 = vsel %vm1371_vm2, %v4023_v51, -inf }
 0x2ae   :  { %1388 = vmax.xlane.f32.xlu1 %v1387_v6 }
 0x2b2   :  { %v4027_v54 = vpop.f32.mrb[28].mxu1 }
 0x2b3   :  { %v3126_v56 = vpop.f32.mrb[29].mxu1  ;;  %v1390_v57 = vsel %vm1371_vm2, %v4027_v54, -inf }
 0x2b4   :  { %v4031_v58 = vpop.f32.mrb[30].mxu1  ;;  %1391 = vmax.xlane.f32.xlu0 %v1390_v57 }
 0x2b5   :  { %v3127_v59 = vpop.f32.mrb[31].mxu1  ;;  %v1393_v61 = vsel %vm1371_vm2, %v4031_v58, -inf }
 0x2b6   :  { %1394 = vmax.xlane.f32.xlu1 %v1393_v61 }
 0x30d   :  { %v4035_v63 = vpop.f32.mrb[8].mxu0 }
 0x30e   :  { %v3132_v2 = vpop.f32.mrb[9].mxu0  ;;  %v1396_v3 = vsel %vm1371_vm2, %v4035_v63, -inf }
 0x30f   :  { %1397 = vmax.xlane.f32.xlu0 %v1396_v3  ;;  %v4041_v62 = vpop.f32.mrb[10].mxu0 }
 0x310   :  { %v3133_v4 = vpop.f32.mrb[11].mxu0  ;;  %v1399_v11 = vsel %vm1371_vm2, %v4041_v62, -inf }
 0x311   :  { %1400 = vmax.xlane.f32.xlu1 %v1399_v11 }
 0x315   :  { %v4047_v8 = vpop.f32.mrb[32].mxu1 }
 0x316   :  { %v3138_v10 = vpop.f32.mrb[33].mxu1  ;;  %v1402_v12 = vsel %vm1371_vm2, %v4047_v8, -inf }
 0x317   :  { %1403 = vmax.xlane.f32.xlu0 %v1402_v12  ;;  %v4051_v13 = vpop.f32.mrb[34].mxu1 }
 0x318   :  { %v3139_v0 = vpop.f32.mrb[35].mxu1  ;;  %v1405_v15 = vsel %vm1371_vm2, %v4051_v13, -inf }
 0x319   :  { %1406 = vmax.xlane.f32.xlu1 %v1405_v15 }
 0x31d   :  { %v4059_v18 = vpop.f32.mrb[12].mxu0 }
 0x31e   :  { %v3144_v20 = vpop.f32.mrb[13].mxu0  ;;  %v1408_v21 = vsel %vm1371_vm2, %v4059_v18, -inf }
 0x31f   :  { %1409 = vmax.xlane.f32.xlu0 %v1408_v21  ;;  %v4065_v22 = vpop.f32.mrb[14].mxu0 }
 0x320   :  { %v3145_v23 = vpop.f32.mrb[15].mxu0  ;;  %v1411_v14 = vsel %vm1371_vm2, %v4065_v22, -inf }
 0x321   :  { %1412 = vmax.xlane.f32.xlu1 %v1411_v14 }
 0x325   :  { %v4073_v26 = vpop.f32.mrb[36].mxu1 }
 0x326   :  { %v3150_v27 = vpop.f32.mrb[37].mxu1  ;;  %v1414_v28 = vsel %vm1371_vm2, %v4073_v26, -inf }
 0x327   :  { %1415 = vmax.xlane.f32.xlu0 %v1414_v28  ;;  %v4079_v29 = vpop.f32.mrb[38].mxu1 }
 0x328   :  { %v3151_v30 = vpop.f32.mrb[39].mxu1  ;;  %v1417_v31 = vsel %vm1371_vm2, %v4079_v29, -inf }
 0x329   :  { %v1374_v34 = vpop.xlane.xlu0 %1373  ;;  %1418 = vmax.xlane.f32.xlu1 %v1417_v31  ;;  %v4083_v35 = vpop.f32.mrb[16].mxu0 }
 0x32a   :  { %v1468_v36 = vsub.f32 %v4003_v37, %v1374_v34  ;;  %v3156_v38 = vpop.f32.mrb[17].mxu0  ;;  %v1420_v39 = vsel %vm1371_vm2, %v4083_v35, -inf }
 0x32b   :  { %1421 = vmax.xlane.f32.xlu0 %v1420_v39  ;;  %v4088_v41 = vpop.f32.mrb[18].mxu0  ;;  %v1377_v42 = vpop.xlane.xlu1 %1376 }
 0x32c   :  { %v1469_v44 = vsub.f32 %v4007_v40, %v1377_v42  ;;  %v3157_v45 = vpop.f32.mrb[19].mxu0  ;;  %v1423_v47 = vsel %vm1371_vm2, %v4088_v41, -inf  ;;  %v1500_v49 = vmul.f32 1.442695, %v1468_v36 }
 0x32d   :  { %1424 = vmax.xlane.f32.xlu1 %v1423_v47  ;;  %v4093_v48 = vpop.f32.mrb[40].mxu1 }
 0x32e   :  { %v3162_v50 = vpop.f32.mrb[41].mxu1  ;;  %v1426_v37 = vsel %vm1371_vm2, %v4093_v48, -inf  ;;  %v1502_v53 = vmul.f32 1.442695, %v1469_v44  ;;  %3439 = vpow2.f32 %v1500_v49 }
 0x32f   :  { %1427 = vmax.xlane.f32.xlu0 %v1426_v37  ;;  %v4097_v6 = vpop.f32.mrb[42].mxu1 }
 0x330   :  { %v3163_v56 = vpop.f32.mrb[43].mxu1  ;;  %v1429_v40 = vsel %vm1371_vm2, %v4097_v6, -inf  ;;  %3441 = vpow2.f32 %v1502_v53 }
 0x331   :  { %v1380_v57 = vpop.xlane.xlu0 %1379  ;;  %1430 = vmax.xlane.f32.xlu1 %v1429_v40  ;;  %v4101_v59 = vpop.f32.mrb[20].mxu0 }
 0x332   :  { %v3168_v61 = vpop.f32.mrb[21].mxu0  ;;  %v1432_v2 = vsel %vm1371_vm2, %v4101_v59, -inf  ;;  %v1470_v10 = vsub.f32 %v4011_v43, %v1380_v57 }
 0x333   :  { %1433 = vmax.xlane.f32.xlu0 %v1432_v2  ;;  %v4105_v3 = vpop.f32.mrb[22].mxu0 }
 0x334   :  { %v3169_v4 = vpop.f32.mrb[23].mxu0  ;;  %v1435_v11 = vsel %vm1371_vm2, %v4105_v3, -inf  ;;  %v1504_v28 = vmul.f32 1.442695, %v1470_v10 }
 0x335   :  { %v1383_v12 = vpop.xlane.xlu0 %1382  ;;  %1436 = vmax.xlane.f32.xlu1 %v1435_v11  ;;  %v4110_v0 = vpop.f32.mrb[44].mxu1 }
 0x336   :  { %v3174_v15 = vpop.f32.mrb[45].mxu1  ;;  %v1438_v20 = vsel %vm1371_vm2, %v4110_v0, -inf  ;;  %v1471_v21 = vsub.f32 %v4015_v46, %v1383_v12  ;;  %3443 = vpow2.f32 %v1504_v28 }
 0x337   :  { %1439 = vmax.xlane.f32.xlu0 %v1438_v20  ;;  %v4115_v23 = vpop.f32.mrb[46].mxu1 }
 0x338   :  { %v3175_v14 = vpop.f32.mrb[47].mxu1  ;;  %v1441_v27 = vsel %vm1371_vm2, %v4115_v23, -inf  ;;  %v4123_v34 = vpop.eup %3439  ;;  %v1506_v36 = vmul.f32 1.442695, %v1471_v21 }
 0x339   :  { %1442 = vmax.xlane.f32.xlu1 %v1441_v27  ;;  %v4119_v43 = vpop.f32.mrb[24].mxu0  ;;  %v1564_v47 = vsel %vm1371_vm2, %v4123_v34, 0.0 }
 0x33a   :  { %v3180_v30 = vpop.f32.mrb[25].mxu0  ;;  %v1444_v31 = vsel %vm1371_vm2, %v4119_v43, -inf  ;;  %v4129_v42 = vpop.eup %3441  ;;  %3445 = vpow2.f32 %v1506_v36 }
 0x33b   :  { %1445 = vmax.xlane.f32.xlu0 %v1444_v31  ;;  %v4125_v46 = vpop.f32.mrb[26].mxu0  ;;  %v1567_v37 = vsel %vm1371_vm2, %v4129_v42, 0.0  ;;  %v1386_v36 = vpop.xlane.xlu0 %1385 }
 0x33c   :  { %v3181_v38 = vpop.f32.mrb[27].mxu0  ;;  %v1447_v39 = vsel %vm1371_vm2, %v4125_v46, -inf }
 0x33d   :  { %1448 = vmax.xlane.f32.xlu1 %v1447_v39  ;;  %v4131_v44 = vpop.f32.mrb[48].mxu1  ;;  %v1389_v38 = vpop.xlane.xlu1 %1388  ;;  %v1472_v39 = vsub.f32 %v4019_v5, %v1386_v36 }
 0x33e   :  { %v3186_v45 = vpop.f32.mrb[49].mxu1  ;;  %v1450_v40 = vsel %vm1371_vm2, %v4131_v44, -inf }
 0x33f   :  { %1565 = vadd.xlane.f32.xlu0 %v1564_v47  ;;  %v4135_v49 = vpop.f32.mrb[50].mxu1  ;;  %v1473_v47 = vsub.f32 %v4023_v51, %v1389_v38 }
 0x340   :  { %v3187_v50 = vpop.f32.mrb[51].mxu1  ;;  %v1453_v2 = vsel %vm1371_vm2, %v4135_v49, -inf  ;;  %v4151_v12 = vpop.eup %3443 }
 0x341   :  { %v4139_v53 = vpop.f32.mrb[28].mxu0  ;;  %1568 = vadd.xlane.f32.xlu1 %v1567_v37  ;;  %v1570_v27 = vsel %vm1371_vm2, %v4151_v12, 0.0  ;;  %v1392_v45 = vpop.xlane.xlu0 %1391  ;;  %v1508_v37 = vmul.f32 1.442695, %v1472_v39 }
 0x342   :  { %v3192_v56 = vpop.f32.mrb[29].mxu0  ;;  %v1456_v10 = vsel %vm1371_vm2, %v4139_v53, -inf }
 0x343   :  { %1451 = vmax.xlane.f32.xlu0 %v1450_v40  ;;  %v4143_v57 = vpop.f32.mrb[30].mxu0  ;;  %v1395_v50 = vpop.xlane.xlu1 %1394  ;;  %v1474_v56 = vsub.f32 %v4027_v54, %v1392_v45  ;;  %v1510_v40 = vmul.f32 1.442695, %v1473_v47  ;;  %3447 = vpow2.f32 %v1508_v37 }
 0x344   :  { %v3193_v61 = vpop.f32.mrb[31].mxu0  ;;  %v1459_v21 = vsel %vm1371_vm2, %v4143_v57, -inf  ;;  %v4157_v14 = vpop.eup %3445 }
 0x345   :  { %v4147_v4 = vpop.f32.mrb[52].mxu1  ;;  %1454 = vmax.xlane.f32.xlu1 %v1453_v2  ;;  %v1573_v28 = vsel %vm1371_vm2, %v4157_v14, 0.0  ;;  %v1475_v61 = vsub.f32 %v4031_v58, %v1395_v50  ;;  %v1512_v2 = vmul.f32 1.442695, %v1474_v56  ;;  %3449 = vpow2.f32 %v1510_v40 }
 0x346   :  { %v3198_v11 = vpop.f32.mrb[53].mxu1  ;;  %v1462_v30 = vsel %vm1371_vm2, %v4147_v4, -inf }
 0x347   :  { %1457 = vmax.xlane.f32.xlu0 %v1456_v10  ;;  %v4153_v15 = vpop.f32.mrb[54].mxu1  ;;  %3451 = vpow2.f32 %v1512_v2 }
 0x348   :  { %v3199_v20 = vpop.f32.mrb[55].mxu1  ;;  %v1465_v31 = vsel %vm1371_vm2, %v4153_v15, -inf }
 0x349   :  { %1460 = vmax.xlane.f32.xlu1 %v1459_v21 }
 0x34b   :  { %1571 = vadd.xlane.f32.xlu0 %v1570_v27 }
 0x34d   :  { %1574 = vadd.xlane.f32.xlu1 %v1573_v28 }
 0x34f   :  { %1463 = vmax.xlane.f32.xlu0 %v1462_v30 }
 0x351   :  { %1466 = vmax.xlane.f32.xlu1 %v1465_v31 }
 0x362   :  { %608 = vrot.lane.b32.xlu1 %v3896_v52, %s3674_s15  ;;  %v1514_v52 = vmul.f32 1.442695, %v1475_v61 }
 0x364   :  { %3453 = vpow2.f32 %v1514_v52 }
 0x365   :  { %606 = vrot.lane.b32.xlu0 %v3898_v55, %s3674_s15  ;;  %v4175_v55 = vpop.eup %3447 }
 0x366   :  { %v4177_v11 = vpop.eup %3449  ;;  %v1576_v5 = vsel %vm1371_vm2, %v4175_v55, 0.0 }
 0x367   :  { %v4181_v51 = vpop.eup %3451  ;;  %v1579_v54 = vsel %vm1371_vm2, %v4177_v11, 0.0 }
 0x368   :  { %v1582_v10 = vsel %vm1371_vm2, %v4181_v51, 0.0 }
 0x36e   :  { %v4185_v58 = vpop.eup %3453 }
 0x36f   :  { %v1585_v20 = vsel %vm1371_vm2, %v4185_v58, 0.0 }
 0x384   :  { %1577 = vadd.xlane.f32.xlu0 %v1576_v5 }
 0x386   :  { %1580 = vadd.xlane.f32.xlu1 %v1579_v54 }
 0x388   :  { %1583 = vadd.xlane.f32.xlu0 %v1582_v10 }
 0x38a   :  { %1586 = vadd.xlane.f32.xlu1 %v1585_v20 }
 0x39c   :  { %v1398_v21 = vpop.xlane.xlu0 %1397 }
 0x39d   :  { %v1476_v27 = vsub.f32 %v4035_v63, %v1398_v21 }
 0x39e   :  { %v1401_v28 = vpop.xlane.xlu1 %1400 }
 0x39f   :  { %v1516_v30 = vmul.f32 1.442695, %v1476_v27  ;;  %v1477_v31 = vsub.f32 %v4041_v62, %v1401_v28 }
 0x3a1   :  { %3455 = vpow2.f32 %v1516_v30  ;;  %v1518_v36 = vmul.f32 1.442695, %v1477_v31 }
 0x3a3   :  { %3457 = vpow2.f32 %v1518_v36 }
 0x3a4   :  { %v1404_v38 = vpop.xlane.xlu0 %1403 }
 0x3a5   :  { %v1478_v39 = vsub.f32 %v4047_v8, %v1404_v38 }
 0x3a6   :  { %v1407_v45 = vpop.xlane.xlu1 %1406 }
 0x3a7   :  { %v1520_v47 = vmul.f32 1.442695, %v1478_v39  ;;  %v1479_v50 = vsub.f32 %v4051_v13, %v1407_v45 }
 0x3a9   :  { %3459 = vpow2.f32 %v1520_v47  ;;  %v1522_v37 = vmul.f32 1.442695, %v1479_v50 }
 0x3ab   :  { %v4195_v56 = vpop.eup %3455  ;;  %3461 = vpow2.f32 %v1522_v37 }
 0x3ac   :  { %v1410_v63 = vpop.xlane.xlu0 %1409  ;;  %v1588_v40 = vsel %vm1371_vm2, %v4195_v56, 0.0 }
 0x3ad   :  { %v4199_v62 = vpop.eup %3457  ;;  %v1480_v61 = vsub.f32 %v4059_v18, %v1410_v63  ;;  %1589 = vadd.xlane.f32.xlu0 %v1588_v40 }
 0x3ae   :  { %v1413_v2 = vpop.xlane.xlu1 %1412  ;;  %v1591_v8 = vsel %vm1371_vm2, %v4199_v62, 0.0 }
 0x3af   :  { %v1524_v52 = vmul.f32 1.442695, %v1480_v61  ;;  %v1481_v13 = vsub.f32 %v4065_v22, %v1413_v2  ;;  %1592 = vadd.xlane.f32.xlu1 %v1591_v8 }
 0x3b1   :  { %3463 = vpow2.f32 %v1524_v52  ;;  %v1526_v5 = vmul.f32 1.442695, %v1481_v13 }
 0x3b3   :  { %v4205_v54 = vpop.eup %3459  ;;  %3465 = vpow2.f32 %v1526_v5 }
 0x3b4   :  { %v1416_v10 = vpop.xlane.xlu0 %1415  ;;  %v1594_v20 = vsel %vm1371_vm2, %v4205_v54, 0.0 }
 0x3b5   :  { %v4209_v21 = vpop.eup %3461  ;;  %v1482_v18 = vsub.f32 %v4073_v26, %v1416_v10  ;;  %1595 = vadd.xlane.f32.xlu0 %v1594_v20 }
 0x3b6   :  { %v1419_v27 = vpop.xlane.xlu1 %1418  ;;  %v1597_v28 = vsel %vm1371_vm2, %v4209_v21, 0.0 }
 0x3b7   :  { %v1528_v22 = vmul.f32 1.442695, %v1482_v18  ;;  %v1483_v30 = vsub.f32 %v4079_v29, %v1419_v27  ;;  %1598 = vadd.xlane.f32.xlu1 %v1597_v28 }
 0x3b8   :  { %v1422_v31 = vpop.xlane.xlu0 %1421 }
 0x3b9   :  { %3467 = vpow2.f32 %v1528_v22  ;;  %v1530_v36 = vmul.f32 1.442695, %v1483_v30  ;;  %v1484_v38 = vsub.f32 %v4083_v35, %v1422_v31 }
 0x3ba   :  { %v1425_v39 = vpop.xlane.xlu1 %1424 }
 0x3bb   :  { %v4216_v45 = vpop.eup %3463  ;;  %3469 = vpow2.f32 %v1530_v36  ;;  %v1532_v47 = vmul.f32 1.442695, %v1484_v38  ;;  %v1485_v26 = vsub.f32 %v4088_v41, %v1425_v39 }
 0x3bc   :  { %v1428_v50 = vpop.xlane.xlu0 %1427  ;;  %v1600_v37 = vsel %vm1371_vm2, %v4216_v45, 0.0 }
 0x3bd   :  { %v4221_v63 = vpop.eup %3465  ;;  %3471 = vpow2.f32 %v1532_v47  ;;  %v1534_v29 = vmul.f32 1.442695, %v1485_v26  ;;  %v1486_v40 = vsub.f32 %v4093_v48, %v1428_v50  ;;  %1601 = vadd.xlane.f32.xlu0 %v1600_v37 }
 0x3be   :  { %v1431_v61 = vpop.xlane.xlu1 %1430  ;;  %v1603_v35 = vsel %vm1371_vm2, %v4221_v63, 0.0 }
 0x3bf   :  { %3473 = vpow2.f32 %v1534_v29  ;;  %v1536_v2 = vmul.f32 1.442695, %v1486_v40  ;;  %v1487_v8 = vsub.f32 %v4097_v6, %v1431_v61  ;;  %1604 = vadd.xlane.f32.xlu1 %v1603_v35 }
 0x3c0   :  { %v1434_v41 = vpop.xlane.xlu0 %1433 }
 0x3c1   :  { %3475 = vpow2.f32 %v1536_v2  ;;  %v1538_v52 = vmul.f32 1.442695, %v1487_v8  ;;  %v1488_v13 = vsub.f32 %v4101_v59, %v1434_v41 }
 0x3c2   :  { %v1437_v5 = vpop.xlane.xlu1 %1436 }
 0x3c3   :  { %v4228_v10 = vpop.eup %3467  ;;  %3477 = vpow2.f32 %v1538_v52  ;;  %v1540_v48 = vmul.f32 1.442695, %v1488_v13  ;;  %v1489_v20 = vsub.f32 %v4105_v3, %v1437_v5 }
 0x3c4   :  { %v1440_v18 = vpop.xlane.xlu0 %1439  ;;  %v1606_v27 = vsel %vm1371_vm2, %v4228_v10, 0.0 }
 0x3c5   :  { %v4233_v28 = vpop.eup %3469  ;;  %3479 = vpow2.f32 %v1540_v48  ;;  %v1542_v6 = vmul.f32 1.442695, %v1489_v20  ;;  %v1490_v22 = vsub.f32 %v4110_v0, %v1440_v18  ;;  %1607 = vadd.xlane.f32.xlu0 %v1606_v27 }
 0x3c6   :  { %v1443_v30 = vpop.xlane.xlu1 %1442  ;;  %v1609_v59 = vsel %vm1371_vm2, %v4233_v28, 0.0 }
 0x3c7   :  { %v4238_v31 = vpop.eup %3471  ;;  %3481 = vpow2.f32 %v1542_v6  ;;  %v1544_v36 = vmul.f32 1.442695, %v1490_v22  ;;  %v1491_v3 = vsub.f32 %v4115_v23, %v1443_v30  ;;  %1610 = vadd.xlane.f32.xlu1 %v1609_v59 }
 0x3c8   :  { %v1446_v38 = vpop.xlane.xlu0 %1445  ;;  %v1612_v39 = vsel %vm1371_vm2, %v4238_v31, 0.0 }
 0x3c9   :  { %v4243_v47 = vpop.eup %3473  ;;  %3483 = vpow2.f32 %v1544_v36  ;;  %v1546_v0 = vmul.f32 1.442695, %v1491_v3  ;;  %v1492_v26 = vsub.f32 %v4119_v43, %v1446_v38  ;;  %1613 = vadd.xlane.f32.xlu0 %v1612_v39 }
 0x3ca   :  { %v1449_v50 = vpop.xlane.xlu1 %1448  ;;  %v1615_v37 = vsel %vm1371_vm2, %v4243_v47, 0.0 }
 0x3cb   :  { %v4248_v29 = vpop.eup %3475  ;;  %v1548_v40 = vmul.f32 1.442695, %v1492_v26  ;;  %v1493_v23 = vsub.f32 %v4125_v46, %v1449_v50  ;;  %1616 = vadd.xlane.f32.xlu1 %v1615_v37  ;;  %3485 = vpow2.f32 %v1546_v0 }
 0x3cc   :  { %v1566_v61 = vpop.xlane.xlu0 %1565  ;;  %v1618_v35 = vsel %vm1371_vm2, %v4248_v29, 0.0 }
 0x3cd   :  { %v4253_v2 = vpop.eup %3477  ;;  %3487 = vpow2.f32 %v1548_v40  ;;  %v1550_v43 = vmul.f32 1.442695, %v1493_v23  ;;  %1619 = vadd.xlane.f32.xlu0 %v1618_v35 }
 0x3ce   :  { %3489 = vrcp.f32 %v1566_v61  ;;  %v1569_v8 = vpop.xlane.xlu1 %1568  ;;  %v1621_v41 = vsel %vm1371_vm2, %v4253_v2, 0.0 }
 0x3cf   :  { %v4257_v52 = vpop.eup %3479  ;;  %3491 = vpow2.f32 %v1550_v43  ;;  %1622 = vadd.xlane.f32.xlu1 %v1621_v41 }
 0x3d0   :  { %3493 = vrcp.f32 %v1569_v8  ;;  %v1452_v46 = vpop.xlane.xlu0 %1451  ;;  %v1624_v13 = vsel %vm1371_vm2, %v4257_v52, 0.0 }
 0x3d1   :  { %v4261_v5 = vpop.eup %3481  ;;  %v1494_v48 = vsub.f32 %v4131_v44, %v1452_v46  ;;  %1625 = vadd.xlane.f32.xlu0 %v1624_v13 }
 0x3d2   :  { %v1455_v20 = vpop.xlane.xlu1 %1454  ;;  %v1627_v18 = vsel %vm1371_vm2, %v4261_v5, 0.0 }
 0x3d3   :  { %v4266_v27 = vpop.eup %3483  ;;  %v1552_v6 = vmul.f32 1.442695, %v1494_v48  ;;  %v1495_v22 = vsub.f32 %v4135_v49, %v1455_v20  ;;  %1628 = vadd.xlane.f32.xlu1 %v1627_v18 }
 0x3d4   :  { %v1458_v30 = vpop.xlane.xlu0 %1457  ;;  %v1630_v59 = vsel %vm1371_vm2, %v4266_v27, 0.0 }
 0x3d5   :  { %3495 = vpow2.f32 %v1552_v6  ;;  %v1554_v36 = vmul.f32 1.442695, %v1495_v22  ;;  %v1496_v3 = vsub.f32 %v4139_v53, %v1458_v30  ;;  %1631 = vadd.xlane.f32.xlu0 %v1630_v59  ;;  %v4272_v44 = vpop.eup %3485 }
 0x3d6   :  { %v1461_v38 = vpop.xlane.xlu1 %1460  ;;  %v1633_v41 = vsel %vm1371_vm2, %v4272_v44, 0.0 }
 0x3d7   :  { %v4274_v39 = vpop.eup %3487  ;;  %v1556_v0 = vmul.f32 1.442695, %v1496_v3  ;;  %v1497_v26 = vsub.f32 %v4143_v57, %v1461_v38  ;;  %3497 = vpow2.f32 %v1554_v36 }
 0x3d8   :  { %v3490_v50 = vpop.eup %3489  ;;  %v1572_v49 = vpop.xlane.xlu0 %1571  ;;  %v1636_v37 = vsel %vm1371_vm2, %v4274_v39, 0.0 }
 0x3d9   :  { %v4279_v40 = vpop.eup %3491  ;;  %3499 = vpow2.f32 %v1556_v0  ;;  %v1558_v23 = vmul.f32 1.442695, %v1497_v26  ;;  %1637 = vadd.xlane.f32.xlu1 %v1636_v37  ;;  %v1692_v43 = vmul.f32 %v3490_v50, %v4123_v34 }
 0x3da   :  { %v3494_v53 = vpop.eup %3493  ;;  %3501 = vrcp.f32 %v1572_v49  ;;  %v1575_v61 = vpop.xlane.xlu1 %1574  ;;  %v1639_v35 = vsel %vm1371_vm2, %v4279_v40, 0.0 }
 0x3db   :  { %v1693_v57 = vmul.f32 %v3494_v53, %v4129_v42  ;;  %3503 = vpow2.f32 %v1558_v23  ;;  %1640 = vadd.xlane.f32.xlu0 %v1639_v35 }
 0x3dc   :  { %3505 = vrcp.f32 %v1575_v61  ;;  %v1464_v8 = vpop.xlane.xlu0 %1463 }
 0x3dd   :  { %v1498_v46 = vsub.f32 %v4147_v4, %v1464_v8  ;;  %1634 = vadd.xlane.f32.xlu1 %v1633_v41  ;;  %v1724_v13 = vpack.c.bf16 %v1693_v57, %v1692_v43 }
 0x3de   :  { %v1467_v48 = vpop.xlane.xlu1 %1466 }
 0x3df   :  { %v4288_v20 = vpop.eup %3495  ;;  %v1560_v18 = vmul.f32 1.442695, %v1498_v46  ;;  %3203 = vmatmul.mubr.msk.bf16.vlgmr.msra.gmra.mrb[32].mxu0 %vm1371_vm2, %v1724_v13  ;;  %v1499_v34 = vsub.f32 %v4153_v15, %v1467_v48 }
 0x3e0   :  { %3213 = vmatpush3.bf16.msra.mxu0 %v3909_v60  ;;  %v1642_v42 = vsel %vm1371_vm2, %v4288_v20, 0.0  ;;  %3214 = vmatprep.mubr.msk.bf16.mxu0 %vm3672_vm0, %v3671_v33  ;;  %v4329_v23 = vpop.permute.xlu0 %606 }
 0x3e1   :  { %3507 = vpow2.f32 %v1560_v18  ;;  %v1562_v4 = vmul.f32 1.442695, %v1499_v34  ;;  %1643 = vadd.xlane.f32.xlu0 %v1642_v42  ;;  %3224 = vmatprep.subr.bf16.mxu0 %v3671_v33  ;;  %v4298_v6 = vpop.eup %3497 }
 0x3e2   :  { %v1645_v26 = vsel %vm1371_vm2, %v4298_v6, 0.0  ;;  %v4331_v53 = vpop.permute.xlu1 %608 }
 0x3e3   :  { %v4300_v22 = vpop.eup %3499  ;;  %3509 = vpow2.f32 %v1562_v4 }
 0x3e4   :  { %v3502_v30 = vpop.eup %3501  ;;  %v1648_v15 = vsel %vm1371_vm2, %v4300_v22, 0.0 }
 0x3e5   :  { %v4304_v59 = vpop.eup %3503  ;;  %1649 = vadd.xlane.f32.xlu1 %v1648_v15  ;;  %v1694_v38 = vmul.f32 %v3502_v30, %v4151_v12 }
 0x3e6   :  { %v3506_v36 = vpop.eup %3505  ;;  %v1651_v3 = vsel %vm1371_vm2, %v4304_v59, 0.0 }
 0x3e7   :  { %v1695_v0 = vmul.f32 %v3506_v36, %v4157_v14  ;;  %1652 = vadd.xlane.f32.xlu0 %v1651_v3 }
 0x3e9   :  { %1646 = vadd.xlane.f32.xlu1 %v1645_v26  ;;  %v1725_v50 = vpack.c.bf16 %v1695_v0, %v1694_v38 }
 0x3eb   :  { %v4312_v49 = vpop.eup %3507  ;;  %3209 = vmatmul.mubr.msk.bf16.vlgmr.msra.gmra.mrb[56].mxu1 %vm1371_vm2, %v1725_v50 }
 0x3ec   :  { %3219 = vmatpush3.bf16.msra.mxu1 %v3907_v32  ;;  %v1654_v37 = vsel %vm1371_vm2, %v4312_v49, 0.0  ;;  %3220 = vmatprep.mubr.msk.bf16.mxu1 %vm3672_vm0, %v3671_v33 }
 0x3ed   :  { %v4320_v12 = vpop.eup %3509  ;;  %1655 = vadd.xlane.f32.xlu0 %v1654_v37  ;;  %3230 = vmatprep.subr.bf16.mxu1 %v3671_v33 }
 0x3ee   :  { %v1657_v14 = vsel %vm1371_vm2, %v4320_v12, 0.0 }
 0x3ef   :  { %1658 = vadd.xlane.f32.xlu1 %v1657_v14 }
 0x400   :  { %612 = vrot.lane.b32.xlu1 %v3907_v32, %s3674_s15 }
 0x403   :  { %610 = vrot.lane.b32.xlu0 %v3909_v60, %s3674_s15 }
 0x411   :  { %v1578_v61 = vpop.xlane.xlu0 %1577 }
 0x412   :  { %3511 = vrcp.f32 %v1578_v61 }
 0x413   :  { %v1581_v35 = vpop.xlane.xlu1 %1580 }
 0x414   :  { %3513 = vrcp.f32 %v1581_v35 }
 0x415   :  { %v1584_v43 = vpop.xlane.xlu0 %1583 }
 0x416   :  { %3515 = vrcp.f32 %v1584_v43 }
 0x417   :  { %v1587_v57 = vpop.xlane.xlu1 %1586 }
 0x418   :  { %3517 = vrcp.f32 %v1587_v57 }
 0x41c   :  { %v3512_v8 = vpop.eup %3511 }
 0x41d   :  { %v1696_v46 = vmul.f32 %v3512_v8, %v4175_v55 }
 0x41e   :  { %v3514_v41 = vpop.eup %3513 }
 0x41f   :  { %v1697_v32 = vmul.f32 %v3514_v41, %v4177_v11 }
 0x420   :  { %v3516_v13 = vpop.eup %3515 }
 0x421   :  { %v1726_v60 = vpack.c.bf16 %v1697_v32, %v1696_v46  ;;  %v1698_v18 = vmul.f32 %v3516_v13, %v4181_v51 }
 0x422   :  { %v3518_v48 = vpop.eup %3517 }
 0x423   :  { %v1699_v34 = vmul.f32 %v3518_v48, %v4185_v58  ;;  %3215 = vmatmul.mubr.msk.bf16.vlgmr.msra.gmra.mrb[36].mxu0 %vm1371_vm2, %v1726_v60 }
 0x424   :  { %3225 = vmatpush3.bf16.msra.mxu0 %v4055_v16  ;;  %3226 = vmatprep.mubr.msk.bf16.mxu0 %vm3672_vm0, %v3671_v33 }
 0x425   :  { %v1727_v42 = vpack.c.bf16 %v1699_v34, %v1698_v18  ;;  %3236 = vmatprep.subr.bf16.mxu0 %v3671_v33 }
 0x427   :  { %3221 = vmatmul.mubr.msk.bf16.vlgmr.msra.gmra.mrb[60].mxu1 %vm1371_vm2, %v1727_v42 }
 0x428   :  { %3231 = vmatpush3.bf16.msra.mxu1 %v4039_v9  ;;  %3232 = vmatprep.mubr.msk.bf16.mxu1 %vm3672_vm0, %v3671_v33 }
 0x429   :  { %3242 = vmatprep.subr.bf16.mxu1 %v3671_v33 }
 0x43a   :  { %v1590_v55 = vpop.xlane.xlu0 %1589 }
 0x43b   :  { %3519 = vrcp.f32 %v1590_v55 }
 0x43c   :  { %v1593_v11 = vpop.xlane.xlu1 %1592 }
 0x43d   :  { %3521 = vrcp.f32 %v1593_v11 }
 0x442   :  { %v1596_v16 = vpop.xlane.xlu0 %1595 }
 0x443   :  { %3523 = vrcp.f32 %v1596_v16 }
 0x444   :  { %v1599_v51 = vpop.xlane.xlu1 %1598 }
 0x445   :  { %v3520_v58 = vpop.eup %3519  ;;  %3525 = vrcp.f32 %v1599_v51 }
 0x446   :  { %v1700_v30 = vmul.f32 %v3520_v58, %v4195_v56 }
 0x447   :  { %v3522_v4 = vpop.eup %3521 }
 0x448   :  { %v1701_v15 = vmul.f32 %v3522_v4, %v4199_v62 }
 0x44a   :  { %v1602_v9 = vpop.xlane.xlu0 %1601  ;;  %v1728_v36 = vpack.c.bf16 %v1701_v15, %v1700_v30 }
 0x44b   :  { %3527 = vrcp.f32 %v1602_v9 }
 0x44c   :  { %3227 = vmatmul.mubr.msk.bf16.vlgmr.msra.gmra.mrb[40].mxu0 %vm1371_vm2, %v1728_v36  ;;  %v1605_v3 = vpop.xlane.xlu1 %1604 }
 0x44d   :  { %v3524_v38 = vpop.eup %3523  ;;  %3237 = vmatpush3.bf16.msra.mxu0 %v4071_v25  ;;  %3529 = vrcp.f32 %v1605_v3  ;;  %3238 = vmatprep.mubr.msk.bf16.mxu0 %vm3672_vm0, %v3671_v33 }
 0x44e   :  { %3248 = vmatprep.subr.bf16.mxu0 %v3671_v33  ;;  %v1702_v56 = vmul.f32 %v3524_v38, %v4205_v54 }
 0x44f   :  { %v3526_v0 = vpop.eup %3525 }
 0x450   :  { %v1703_v62 = vmul.f32 %v3526_v0, %v4209_v21 }
 0x452   :  { %v1608_v26 = vpop.xlane.xlu0 %1607  ;;  %v1729_v50 = vpack.c.bf16 %v1703_v62, %v1702_v56 }
 0x453   :  { %3531 = vrcp.f32 %v1608_v26 }
 0x454   :  { %3233 = vmatmul.mubr.msk.bf16.vlgmr.msra.gmra.mrb[64].mxu1 %vm1371_vm2, %v1729_v50  ;;  %v1611_v37 = vpop.xlane.xlu1 %1610 }
 0x455   :  { %v3528_v14 = vpop.eup %3527  ;;  %3243 = vmatpush3.bf16.msra.mxu1 %v4057_v17  ;;  %3533 = vrcp.f32 %v1611_v37  ;;  %3244 = vmatprep.mubr.msk.bf16.mxu1 %vm3672_vm0, %v3671_v33 }
 0x456   :  { %v1614_v25 = vpop.xlane.xlu0 %1613  ;;  %3254 = vmatprep.subr.bf16.mxu1 %v3671_v33  ;;  %v1704_v54 = vmul.f32 %v3528_v14, %v4216_v45 }
 0x457   :  { %v3530_v61 = vpop.eup %3529  ;;  %3535 = vrcp.f32 %v1614_v25 }
 0x458   :  { %v1705_v21 = vmul.f32 %v3530_v61, %v4221_v63  ;;  %v1617_v35 = vpop.xlane.xlu1 %1616 }
 0x459   :  { %3537 = vrcp.f32 %v1617_v35  ;;  %v3416_v35 = vld [vmem:[#allocation7 + $0x8] sm:$0xff]  }
 0x45a   :  { %v1620_v43 = vpop.xlane.xlu0 %1619  ;;  %v1730_v57 = vpack.c.bf16 %v1705_v21, %v1704_v54 }
 0x45b   :  { %3539 = vrcp.f32 %v1620_v43 }
 0x45c   :  { %3239 = vmatmul.mubr.msk.bf16.vlgmr.msra.gmra.mrb[44].mxu0 %vm1371_vm2, %v1730_v57  ;;  %v1623_v17 = vpop.xlane.xlu1 %1622 }
 0x45d   :  { %v3532_v8 = vpop.eup %3531  ;;  %3249 = vmatpush3.bf16.msra.mxu0 %v4063_v19  ;;  %3541 = vrcp.f32 %v1623_v17  ;;  %3250 = vmatprep.mubr.msk.bf16.mxu0 %vm3672_vm0, %v3671_v33 }
 0x45e   :  { %v1626_v41 = vpop.xlane.xlu0 %1625  ;;  %3260 = vmatprep.subr.bf16.mxu0 %v3671_v33  ;;  %v1706_v63 = vmul.f32 %v3532_v8, %v4228_v10  ;;  %v3417_v8 = vld [vmem:[#allocation7 + $0x10] sm:$0xff]  }
 0x45f   :  { %v3534_v45 = vpop.eup %3533  ;;  %3543 = vrcp.f32 %v1626_v41 }
 0x460   :  { %v1707_v46 = vmul.f32 %v3534_v45, %v4233_v28  ;;  %v1629_v32 = vpop.xlane.xlu1 %1628 }
 0x461   :  { %v3536_v13 = vpop.eup %3535  ;;  %3545 = vrcp.f32 %v1629_v32 }
 0x462   :  { %v1731_v60 = vpack.c.bf16 %v1707_v46, %v1706_v63  ;;  %v1708_v19 = vmul.f32 %v3536_v13, %v4238_v31  ;;  %v1632_v34 = vpop.xlane.xlu0 %1631 }
 0x463   :  { %v3538_v48 = vpop.eup %3537 }
 0x464   :  { %v1709_v18 = vmul.f32 %v3538_v48, %v4243_v47  ;;  %3245 = vmatmul.mubr.msk.bf16.vlgmr.msra.gmra.mrb[68].mxu1 %vm1371_vm2, %v1731_v60 }
 0x465   :  { %v3540_v42 = vpop.eup %3539  ;;  %3255 = vmatpush3.bf16.msra.mxu1 %v4045_v7  ;;  %3256 = vmatprep.mubr.msk.bf16.mxu1 %vm3672_vm0, %v3671_v33 }
 0x466   :  { %v1638_v10 = vpop.xlane.xlu1 %1637  ;;  %v1732_v28 = vpack.c.bf16 %v1709_v18, %v1708_v19  ;;  %3266 = vmatprep.subr.bf16.mxu1 %v3671_v33  ;;  %v1710_v11 = vmul.f32 %v3540_v42, %v4248_v29  ;;  %v3418_v19 = vld [vmem:[#allocation7 + $0x18] sm:$0xff]  }
 0x467   :  { %v3542_v55 = vpop.eup %3541  ;;  %3547 = vrcp.f32 %v1638_v10 }
 0x468   :  { %v1711_v31 = vmul.f32 %v3542_v55, %v4253_v2  ;;  %3549 = vrcp.f32 %v1632_v34  ;;  %v1641_v47 = vpop.xlane.xlu0 %1640  ;;  %3251 = vmatmul.mubr.msk.bf16.vlgmr.msra.gmra.mrb[48].mxu0 %vm1371_vm2, %v1732_v28 }
 0x469   :  { %v3544_v16 = vpop.eup %3543  ;;  %3551 = vrcp.f32 %v1641_v47  ;;  %3261 = vmatpush3.bf16.msra.mxu0 %v4077_v1  ;;  %3262 = vmatprep.mubr.msk.bf16.mxu0 %vm3672_vm0, %v3671_v33 }
 0x46a   :  { %v1635_v7 = vpop.xlane.xlu1 %1634  ;;  %v1733_v51 = vpack.c.bf16 %v1711_v31, %v1710_v11  ;;  %3272 = vmatprep.subr.bf16.mxu0 %v3671_v33  ;;  %v1712_v29 = vmul.f32 %v3544_v16, %v4257_v52 }
 0x46b   :  { %v3546_v58 = vpop.eup %3545  ;;  %3553 = vrcp.f32 %v1635_v7 }
 0x46c   :  { %v1713_v2 = vmul.f32 %v3546_v58, %v4261_v5  ;;  %3257 = vmatmul.mubr.msk.bf16.vlgmr.msra.gmra.mrb[72].mxu1 %vm1371_vm2, %v1733_v51 }
 0x46d   :  { %3267 = vmatpush3.bf16.msra.mxu1 %v4069_v24  ;;  %3268 = vmatprep.mubr.msk.bf16.mxu1 %vm3672_vm0, %v3671_v33 }
 0x46e   :  { %v1734_v1 = vpack.c.bf16 %v1713_v2, %v1712_v29  ;;  %3278 = vmatprep.subr.bf16.mxu1 %v3671_v33  ;;  %v1644_v4 = vpop.xlane.xlu0 %1643 }
 0x470   :  { %3263 = vmatmul.mubr.msk.bf16.vlgmr.msra.gmra.mrb[52].mxu0 %vm1371_vm2, %v1734_v1 }
 0x471   :  { %v3548_v30 = vpop.eup %3547  ;;  %3273 = vmatpush3.bf16.msra.mxu0 %v4329_v23  ;;  %3274 = vmatprep.mubr.msk.bf16.mxu0 %vm3672_vm0, %v3671_v33 }
 0x472   :  { %v3550_v52 = vpop.eup %3549  ;;  %v1650_v5 = vpop.xlane.xlu1 %1649  ;;  %3284 = vmatprep.subr.bf16.mxu0 %v3671_v33  ;;  %v1716_v15 = vmul.f32 %v3548_v30, %v4274_v39 }
 0x473   :  { %v3552_v24 = vpop.eup %3551  ;;  %3555 = vrcp.f32 %v1650_v5  ;;  %v1714_v38 = vmul.f32 %v3550_v52, %v4266_v27 }
 0x474   :  { %v1717_v9 = vmul.f32 %v3552_v24, %v4279_v40  ;;  %3557 = vrcp.f32 %v1644_v4  ;;  %v1653_v36 = vpop.xlane.xlu0 %1652  ;;  %v3420_v24 = vld [vmem:[#allocation7 + $0x28] sm:$0xff]  }
 0x475   :  { %v3554_v3 = vpop.eup %3553  ;;  %3559 = vrcp.f32 %v1653_v36 }
 0x476   :  { %v1715_v23 = vmul.f32 %v3554_v3, %v4272_v44  ;;  %v1647_v0 = vpop.xlane.xlu1 %1646  ;;  %v1736_v56 = vpack.c.bf16 %v1717_v9, %v1716_v15  ;;  %v3415_v44 = vld [vmem:[#allocation7] sm:$0xff]   ;;  %v3421_v15 = vld [vmem:[#allocation7 + $0x30] sm:$0xff]  }
 0x477   :  { %3561 = vrcp.f32 %v1647_v0 }
 0x478   :  { %3275 = vmatmul.mubr.msk.bf16.vlgmr.msra.gmra.mrb[56].mxu0 %vm1371_vm2, %v1736_v56  ;;  %v1735_v62 = vpack.c.bf16 %v1715_v23, %v1714_v38 }
 0x479   :  { %3286 = vmatprep.mubr.msk.bf16.mxu0 %vm3672_vm0, %v3671_v33 }
 0x47a   :  { %v1656_v39 = vpop.xlane.xlu0 %1655  ;;  %3269 = vmatmul.mubr.msk.bf16.vlgmr.msra.gmra.mrb[76].mxu1 %vm1371_vm2, %v1735_v62 }
 0x47b   :  { %3279 = vmatpush3.bf16.msra.mxu1 %v4331_v53  ;;  %3280 = vmatprep.mubr.msk.bf16.mxu1 %vm3672_vm0, %v3671_v33  ;;  %3563 = vrcp.f32 %v1656_v39 }
 0x47c   :  { %v1659_v27 = vpop.xlane.xlu1 %1658  ;;  %3290 = vmatprep.subr.bf16.mxu1 %v3671_v33 }
 0x47d   :  { %v3556_v40 = vpop.eup %3555  ;;  %3565 = vrcp.f32 %v1659_v27 }
 0x47e   :  { %v3558_v26 = vpop.eup %3557  ;;  %v611_v50 = vpop.permute.xlu0 %610  ;;  %v1720_v14 = vmul.f32 %v3556_v40, %v4300_v22 }
 0x47f   :  { %v3560_v37 = vpop.eup %3559  ;;  %3285 = vmatpush3.bf16.msra.mxu0 %v611_v50  ;;  %v1718_v61 = vmul.f32 %v3558_v26, %v4288_v20 }
 0x480   :  { %v1721_v25 = vmul.f32 %v3560_v37, %v4304_v59  ;;  %3296 = vmatprep.subr.bf16.mxu0 %v3415_v44  ;;  %v613_v17 = vpop.permute.xlu1 %612 }
 0x481   :  { %v3562_v53 = vpop.eup %3561 }
 0x482   :  { %v1719_v54 = vmul.f32 %v3562_v53, %v4298_v6  ;;  %v1738_v21 = vpack.c.bf16 %v1721_v25, %v1720_v14 }
 0x484   :  { %3287 = vmatmul.mubr.msk.bf16.vlgmr.msra.gmra.mrb[60].mxu0 %vm1371_vm2, %v1738_v21  ;;  %v1737_v43 = vpack.c.bf16 %v1719_v54, %v1718_v61  ;;  %v3422_v21 = vld [vmem:[#allocation7 + $0x38] sm:$0xff]  }
 0x485   :  { %3297 = vmatpush3.bf16.msra.mxu0 %v3415_v44  ;;  %v3564_v57 = vpop.eup %3563 }
 0x486   :  { %3281 = vmatmul.mubr.msk.bf16.vlgmr.msra.gmra.mrb[80].mxu1 %vm1371_vm2, %v1737_v43  ;;  %3298 = vmatprep.subr.bf16.mxu0 %v3416_v35  ;;  %v1722_v6 = vmul.f32 %v3564_v57, %v4312_v49  ;;  %v3419_v49 = vld [vmem:[#allocation7 + $0x20] sm:$0xff]  }
 0x487   :  { %v3566_v22 = vpop.eup %3565  ;;  %3291 = vmatpush3.bf16.msra.mxu1 %v613_v17  ;;  %3292 = vmatprep.mubr.msk.bf16.mxu1 %vm3672_vm0, %v3671_v33 }
 0x488   :  { %v1723_v20 = vmul.f32 %v3566_v22, %v4320_v12 }
 0x489   :  { %3299 = vmatpush3.bf16.msra.mxu0 %v3416_v35 }
 0x48a   :  { %v1739_v59 = vpack.c.bf16 %v1723_v20, %v1722_v6  ;;  %3308 = vmatprep.subr.bf16.mxu0 %v3417_v8 }
 0x48e   :  { %3293 = vmatmul.mubr.msk.bf16.vlgmr.msra.gmra.mrb[84].mxu1 %vm1371_vm2, %v1739_v59 }
 0x4b2   :  { %v1777_v41 = vpop.f32.mrb[32].mxu0 }
 0x4b3   :  { %v3204_v45 = vpop.f32.mrb[33].mxu0 }
 0x4b4   :  { %v1780_v63 = vpop.f32.mrb[34].mxu0 }
 0x4b5   :  { %v2444_v46 = vpack.c.bf16 %v1780_v63, %v1777_v41  ;;  %v3205_v32 = vpop.f32.mrb[35].mxu0 }
 0x4b7   :  { %3300 = vmatprep.mubr.msk.bf16.mxu0 %vm618_vm1, %v2444_v46 }
 0x4be   :  { %v1821_v13 = vpop.f32.mrb[56].mxu1 }
 0x4bf   :  { %v3210_v60 = vpop.f32.mrb[57].mxu1 }
 0x4c0   :  { %v1824_v33 = vpop.f32.mrb[58].mxu1 }
 0x4c1   :  { %v2445_v48 = vpack.c.bf16 %v1824_v33, %v1821_v13  ;;  %v3211_v12 = vpop.f32.mrb[59].mxu1 }
 0x4c3   :  { %3301 = vmatmul.mubr.msk.bf16.vlgmr.msra.gmra.mrb[64].mxu0 %vm618_vm1, %v2445_v48 }
 0x4c4   :  { %3309 = vmatpush3.bf16.msra.mxu0 %v3417_v8 }
 0x4c5   :  { %3310 = vmatprep.subr.bf16.mxu0 %v3418_v19 }
 0x4c8   :  { %3311 = vmatpush3.bf16.msra.mxu0 %v3418_v19 }
 0x4c9   :  { %3320 = vmatprep.subr.bf16.mxu0 %v3419_v49 }
 0x4f6   :  { %v1865_v18 = vpop.f32.mrb[36].mxu0 }
 0x4f7   :  { %v3216_v34 = vpop.f32.mrb[37].mxu0 }
 0x4f8   :  { %v1868_v42 = vpop.f32.mrb[38].mxu0 }
 0x4f9   :  { %v2446_v10 = vpack.c.bf16 %v1868_v42, %v1865_v18  ;;  %v3217_v28 = vpop.f32.mrb[39].mxu0 }
 0x4fa   :  { %v1909_v55 = vpop.f32.mrb[60].mxu1 }
 0x4fb   :  { %v3222_v11 = vpop.f32.mrb[61].mxu1  ;;  %3304 = vmatprep.mubr.msk.bf16.mxu0 %vm618_vm1, %v2446_v10 }
 0x4fc   :  { %v1912_v31 = vpop.f32.mrb[62].mxu1 }
 0x4fd   :  { %v2447_v47 = vpack.c.bf16 %v1912_v31, %v1909_v55  ;;  %v3223_v16 = vpop.f32.mrb[63].mxu1 }
 0x4fe   :  { %v2979_v16 = vld [vmem:[%s4458_s5] ss:$0 sm:$0xff]  ;;  %s3633_s5 = scalar_lea.vmem %s2885_s19, 1024 }
 0x4ff   :  { %3305 = vmatmul.mubr.msk.bf16.gmra.mrb[68].mxu0 %vm618_vm1, %v2447_v47  ;;  %p3634_p10 = scmp.ne.s32.totalorder %s2885_s19, %s3633_s5  ;;  %p3639_p12 = scmp.lt.s32.totalorder %s3633_s5, %s3633_s5 }
 0x501   :  { %p3640_p13 = por %p3639_p12, %p3638_p11 }
 0x503   :  { %p3641_p0 = pnand %p3640_p13, %p3634_p10 }
 0x51f   :  { %v1953_v7 = vpop.f32.mrb[40].mxu0 }
 0x520   :  { %v3228_v51 = vpop.f32.mrb[41].mxu0 }
 0x521   :  { %v1956_v58 = vpop.f32.mrb[42].mxu0 }
 0x522   :  { %v2448_v29 = vpack.c.bf16 %v1956_v58, %v1953_v7  ;;  %v3229_v2 = vpop.f32.mrb[43].mxu0 }
 0x524   :  { %3312 = vmatprep.mubr.msk.bf16.mxu0 %vm618_vm1, %v2448_v29 }
 0x527   :  { %v1997_v1 = vpop.f32.mrb[64].mxu1 }
 0x528   :  { %v3234_v4 = vpop.f32.mrb[65].mxu1 }
 0x529   :  { %v2000_v30 = vpop.f32.mrb[66].mxu1 }
 0x52a   :  { %v2449_v52 = vpack.c.bf16 %v2000_v30, %v1997_v1  ;;  %v3235_v5 = vpop.f32.mrb[67].mxu1 }
 0x52c   :  { %3313 = vmatmul.mubr.msk.bf16.vlgmr.msra.gmra.mrb[64].mxu0 %vm618_vm1, %v2449_v52 }
 0x52d   :  { %3321 = vmatpush3.bf16.msra.mxu0 %v3419_v49 }
 0x52e   :  { %3322 = vmatprep.subr.bf16.mxu0 %v3420_v24 }
 0x52f   :  { %v2041_v9 = vpop.f32.mrb[44].mxu0 }
 0x530   :  { %v3240_v36 = vpop.f32.mrb[45].mxu0 }
 0x531   :  { %v2044_v3 = vpop.f32.mrb[46].mxu0  ;;  %3323 = vmatpush3.bf16.msra.mxu0 %v3420_v24 }
 0x532   :  { %v2450_v38 = vpack.c.bf16 %v2044_v3, %v2041_v9  ;;  %v3241_v23 = vpop.f32.mrb[47].mxu0  ;;  %3332 = vmatprep.subr.bf16.mxu0 %v3421_v15 }
 0x534   :  { %3316 = vmatprep.mubr.msk.bf16.mxu0 %vm618_vm1, %v2450_v38 }
 0x537   :  { %v2085_v0 = vpop.f32.mrb[68].mxu1 }
 0x538   :  { %v3246_v56 = vpop.f32.mrb[69].mxu1 }
 0x539   :  { %v2088_v62 = vpop.f32.mrb[70].mxu1 }
 0x53a   :  { %v2451_v39 = vpack.c.bf16 %v2088_v62, %v2085_v0  ;;  %v3247_v27 = vpop.f32.mrb[71].mxu1 }
 0x53b   :  { %v2129_v44 = vpop.f32.mrb[48].mxu0 }
 0x53c   :  { %v3252_v40 = vpop.f32.mrb[49].mxu0  ;;  %3317 = vmatmul.mubr.msk.bf16.gmra.mrb[68].mxu0 %vm618_vm1, %v2451_v39 }
 0x53d   :  { %v2132_v26 = vpop.f32.mrb[50].mxu0 }
 0x53e   :  { %v2452_v50 = vpack.c.bf16 %v2132_v26, %v2129_v44  ;;  %v3253_v37 = vpop.f32.mrb[51].mxu0 }
 0x53f   :  { %v2173_v14 = vpop.f32.mrb[72].mxu1 }
 0x540   :  { %v3258_v25 = vpop.f32.mrb[73].mxu1  ;;  %3324 = vmatprep.mubr.msk.bf16.mxu0 %vm618_vm1, %v2452_v50 }
 0x541   :  { %v2176_v53 = vpop.f32.mrb[74].mxu1 }
 0x542   :  { %v2453_v61 = vpack.c.bf16 %v2176_v53, %v2173_v14  ;;  %v3259_v54 = vpop.f32.mrb[75].mxu1 }
 0x543   :  { %v2217_v35 = vpop.f32.mrb[52].mxu0 }
 0x544   :  { %v3264_v43 = vpop.f32.mrb[53].mxu0  ;;  %3325 = vmatmul.mubr.msk.bf16.vlgmr.msra.gmra.mrb[64].mxu0 %vm618_vm1, %v2453_v61 }
 0x545   :  { %v2220_v57 = vpop.f32.mrb[54].mxu0  ;;  %3333 = vmatpush3.bf16.msra.mxu0 %v3421_v15 }
 0x546   :  { %v2454_v17 = vpack.c.bf16 %v2220_v57, %v2217_v35  ;;  %v3265_v22 = vpop.f32.mrb[55].mxu0  ;;  %3334 = vmatprep.subr.bf16.mxu0 %v3422_v21 }
 0x548   :  { %3328 = vmatprep.mubr.msk.bf16.mxu0 %vm618_vm1, %v2454_v17 }
 0x549   :  { %3335 = vmatpush3.bf16.msra.mxu0 %v3422_v21 }
 0x54b   :  { %v2305_v20 = vpop.f32.mrb[56].mxu0 }
 0x54c   :  { %v3276_v6 = vpop.f32.mrb[57].mxu0 }
 0x54d   :  { %v2261_v59 = vpop.f32.mrb[76].mxu1  ;;  %v2308_v8 = vpop.f32.mrb[58].mxu0 }
 0x54e   :  { %v2456_v41 = vpack.c.bf16 %v2308_v8, %v2305_v20  ;;  %v3270_v45 = vpop.f32.mrb[77].mxu1  ;;  %v3277_v63 = vpop.f32.mrb[59].mxu0 }
 0x54f   :  { %v2264_v46 = vpop.f32.mrb[78].mxu1 }
 0x550   :  { %v2455_v32 = vpack.c.bf16 %v2264_v46, %v2261_v59  ;;  %v3271_v13 = vpop.f32.mrb[79].mxu1 }
 0x552   :  { %3329 = vmatmul.mubr.msk.bf16.gmra.mrb[68].mxu0 %vm618_vm1, %v2455_v32 }
 0x553   :  { %3336 = vmatprep.mubr.msk.bf16.mxu0 %vm618_vm1, %v2456_v41 }
 0x557   :  { %v2393_v60 = vpop.f32.mrb[60].mxu0 }
 0x558   :  { %v3288_v33 = vpop.f32.mrb[61].mxu0 }
 0x559   :  { %v2349_v48 = vpop.f32.mrb[80].mxu1  ;;  %v2396_v12 = vpop.f32.mrb[62].mxu0 }
 0x55a   :  { %v2458_v19 = vpack.c.bf16 %v2396_v12, %v2393_v60  ;;  %v3282_v49 = vpop.f32.mrb[81].mxu1  ;;  %v3289_v18 = vpop.f32.mrb[63].mxu0 }
 0x55b   :  { %v2352_v34 = vpop.f32.mrb[82].mxu1 }
 0x55c   :  { %v2457_v42 = vpack.c.bf16 %v2352_v34, %v2349_v48  ;;  %v3283_v10 = vpop.f32.mrb[83].mxu1 }
 0x55e   :  { %3337 = vmatmul.mubr.msk.bf16.vlgmr.msra.gmra.mrb[64].mxu0 %vm618_vm1, %v2457_v42 }
 0x55f   :  { %3340 = vmatprep.mubr.msk.bf16.mxu0 %vm618_vm1, %v2458_v19 }
 0x561   :  { %v2437_v28 = vpop.f32.mrb[84].mxu1 }
 0x562   :  { %v3294_v55 = vpop.f32.mrb[85].mxu1 }
 0x563   :  { %v2440_v11 = vpop.f32.mrb[86].mxu1 }
 0x564   :  { %v2459_v31 = vpack.c.bf16 %v2440_v11, %v2437_v28  ;;  %v3295_v47 = vpop.f32.mrb[87].mxu1 }
 0x566   :  { %3341 = vmatmul.mubr.msk.bf16.gmra.mrb[68].mxu0 %vm618_vm1, %v2459_v31 }
 0x631   :  { %v3338_v7 = vpop.f32.mrb[64].mxu0 }
 0x632   :  { %v2865_v51 = vadd.f32 %v3338_v7, %v2979_v16  ;;  %v2801_v58 = vpop.f32.mrb[65].mxu0 }
 0x633   :  { %v2863_v29 = vadd.f32 %v2979_v16, %v2801_v58  ;;  %v3339_v2 = vpop.f32.mrb[66].mxu0 }
 0x634   :  { %2873 = vst [vmem:[#allocation8 + $0x10] sm:$0xff] %v2865_v51  ;;  %v2866_v1 = vadd.f32 %v3339_v2, %v2979_v16  ;;  %v2804_v4 = vpop.f32.mrb[67].mxu0 }
 0x635   :  { %2871 = vst [vmem:[#allocation8] sm:$0xff] %v2863_v29  ;;  %v2864_v30 = vadd.f32 %v2979_v16, %v2804_v4 }
 0x636   :  { %2874 = vst [vmem:[#allocation8 + $0x18] sm:$0xff] %v2866_v1 }
 0x637   :  { %2872 = vst [vmem:[#allocation8 + $0x8] sm:$0xff] %v2864_v30 }
 0x639   :  { %v3342_v52 = vpop.f32.mrb[68].mxu0 }
 0x63a   :  { %v2869_v5 = vadd.f32 %v3342_v52, %v2979_v16  ;;  %v2817_v24 = vpop.f32.mrb[69].mxu0 }
 0x63b   :  { %v2867_v15 = vadd.f32 %v2979_v16, %v2817_v24  ;;  %v3343_v9 = vpop.f32.mrb[70].mxu0 }
 0x63c   :  { %2877 = vst [vmem:[#allocation8 + $0x30] sm:$0xff] %v2869_v5  ;;  %v2870_v36 = vadd.f32 %v3343_v9, %v2979_v16  ;;  %v2820_v3 = vpop.f32.mrb[71].mxu0 }
 0x63d   :  { %2875 = vst [vmem:[#allocation8 + $0x20] sm:$0xff] %v2867_v15  ;;  %v2868_v38 = vadd.f32 %v2979_v16, %v2820_v3 }
 0x63e   :  { %2878 = vst [vmem:[#allocation8 + $0x38] sm:$0xff] %v2870_v36 }
 0x63f   :  { %2876 = vst [vmem:[#allocation8 + $0x28] sm:$0xff] %v2868_v38 }
 0x640   :  { %3644 = shalt.err (!%p3641_p0)
}
 0x641   :  { %s3645_s23 = scalar_lea.hbm %s4459_s6, 1024 }
 0x642   :  { %p3646_p1 = scmp.ne.s32.totalorder %s4459_s6, %s3645_s23  ;;  %p3649_p2 = scmp.lt.u32.totalorder %s3645_s23, %s4459_s6 }
 0x644   :  { %p3651_p3 = pnand %p3649_p2, %p3646_p1 }
 0x646   :  { %3654 = shalt.err (!%p3651_p3)
}
 0x647   :  { %2890 = dma.vmem_to_hbm [thread:$0]  %s2885_s19, 1024, %s4459_s6, [#allocation4], %s3665_s3, %s3665_s3, %s3666_s21  }
 0x648   :  { %3659 = dma.done.wait [#allocation4], 1024  }
 0x649   :  { %3660 = vsyncadd [#allocation4], 4294966272 }
 0x64a   :  { %2894 = vsyncpa [#allocation3], 1 }
 0x64b   :  { %2895 = vsyncpa [#allocation6], 1 }
 0x64c   :  { %2896 = vsyncpa [#allocation4], 1 }

</bundles_post_ra>
